<compile_context>
chip_gen: v5e
topology: v5e:2x2
jax: 0.10.0
libtpu: 0.0.40
codegen_flags: <defaults>
</compile_context>

<pallas_src>
import functools

import numpy as np
import jax
import jax.numpy as jnp
from jax.experimental import pallas as pl
from jax.experimental.pallas import tpu as pltpu


def _region_bottleneck_kernel(x_ref, m_ref, tm_ref, w_ref, p_ref, out_ref,
                              *, W, eps):
  """Fused conv3x3 -> BN(batch stats)+ReLU -> conv3x3 -> BN+ReLU -> *mask -> +x.

  Shapes (all full VMEM blocks, grid=(1,)):
    x_ref  : (B, C, HW)    activations / residual, f32
    m_ref  : (B, 1, HW)    region mask (or (B, C, HW)), f32
    tm_ref : (9, 1, HW)    precomputed 3x3 boundary-validity masks, f32
    w_ref  : (2, 9, C, C)  conv weights, tap-major (W_t = w[conv, t])
    p_ref  : (C, 4)        columns = [gamma1, beta1, gamma2, beta2]
    out_ref: (B, C, HW)
  """
  B, C, HW = x_ref.shape

  # Flat-position shift of each 3x3 tap (relative to the output position).
  shifts = [(t // 3 - 1) * W + (t % 3 - 1) for t in range(9)]

  def conv3x3(zs, ci):
    """zs: list of B (C, HW) slabs -> list of B (C, HW) conv outputs."""
    outs = []
    for z in zs:
      # Center tap: no roll, no boundary mask needed.
      acc = jnp.dot(w_ref[ci, 4], z, preferred_element_type=jnp.float32)
      for t in range(9):
        if t == 4:
          continue
        # Roll along the flat H*W axis of ONE image; any wrap across a row /
        # image boundary lands exactly on positions the tap mask zeroes.
        piece = pltpu.roll(z, shift=(-shifts[t]) % HW, axis=1) * tm_ref[t]
        acc = acc + jnp.dot(w_ref[ci, t], piece,
                            preferred_element_type=jnp.float32)
      outs.append(acc)
    return outs

  def bn_relu(ss, li):
    """Training-mode BatchNorm2d (biased batch stats over B,H,W) + ReLU."""
    gamma = p_ref[:, 2 * li:2 * li + 1]        # (C, 1)
    beta = p_ref[:, 2 * li + 1:2 * li + 2]     # (C, 1)
    # Single pass: elementwise-accumulate sum and sum-of-squares over batch,
    # then one lane reduction each.
    s_sum = ss[0]
    s_sq = ss[0] * ss[0]
    for s in ss[1:]:
      s_sum = s_sum + s
      s_sq = s_sq + s * s
    inv_n = 1.0 / (len(ss) * HW)
    mean = jnp.sum(s_sum, axis=1, keepdims=True) * inv_n        # (C, 1)
    var = jnp.sum(s_sq, axis=1, keepdims=True) * inv_n - mean * mean
    var = jnp.maximum(var, 0.0)    # guard E[x^2]-mean^2 cancellation
    inv = jax.lax.rsqrt(var + eps)
    return [jnp.maximum(gamma * ((s - mean) * inv) + beta, 0.0) for s in ss]

  xs = [x_ref[b] for b in range(B)]            # residual + conv1 input
  ys = bn_relu(conv3x3(xs, 0), 0)
  ys = bn_relu(conv3x3(ys, 1), 1)
  for b in range(B):
    out_ref[b] = xs[b] + ys[b] * m_ref[b]      # mask-gated residual add


def _full_spec(shape):
  nd = len(shape)
  return pl.BlockSpec(shape, lambda i, _nd=nd: (0,) * _nd)


def region_bottleneck_forward(x_nchw, mask, params, eps=1e-5):
  """Wrapper: NCHW x + (B,1,H,W) or (B,C,H,W) mask in, NCHW out."""
  B, C, H, W = x_nchw.shape
  HW = H * W
  mc = mask.shape[1]

  # Pure reshapes of NCHW (trailing-dim collapse, no data movement, no
  # transposes) -- the only layout work done outside the kernel.
  x3d = x_nchw.astype(jnp.float32).reshape(B, C, HW)
  m3d = mask.astype(jnp.float32).reshape(B, mc, HW)

  # Precomputed 3x3 boundary-validity masks, built host-side with numpy.
  pp = np.arange(HW)
  hh, ww = pp // W, pp % W
  tap_mask = np.zeros((9, 1, HW), np.float32)
  for t in range(9):
    dh, dw = t // 3 - 1, t % 3 - 1
    tap_mask[t, 0] = ((hh + dh >= 0) & (hh + dh < H) &
                      (ww + dw >= 0) & (ww + dw < W)).astype(np.float32)
  tap_mask = jnp.asarray(tap_mask)

  # Pack both conv weights tap-major into one (2, 9, C, C) operand.
  def pack_w(w):  # (Cout, Cin, 3, 3) -> (9, Cout, Cin)
    return jnp.transpose(w, (2, 3, 0, 1)).reshape(9, C, C)
  w_packed = jnp.stack([pack_w(params['w1']), pack_w(params['w2'])],
                       axis=0).astype(jnp.float32)

  # Pack BN affine params into one (C, 4) operand.  Conv biases b1/b2 are NOT
  # passed: they cancel exactly under training-mode BatchNorm.
  p_packed = jnp.stack([params['gamma1'], params['beta1'],
                        params['gamma2'], params['beta2']],
                       axis=1).astype(jnp.float32)

  inputs = (x3d, m3d, tap_mask, w_packed, p_packed)

  out3d = pl.pallas_call(
      functools.partial(_region_bottleneck_kernel, W=W, eps=eps),
      out_shape=jax.ShapeDtypeStruct((B, C, HW), jnp.float32),
      grid=(1,),
      in_specs=[_full_spec(a.shape) for a in inputs],
      out_specs=_full_spec((B, C, HW)),
      compiler_params=pltpu.CompilerParams(
          dimension_semantics=("arbitrary",)),
  )(*inputs)

  return out3d.reshape(B, C, H, W)


def region_bottleneck_reference(x, mask, p, eps=1e-5):
  """Plain-JAX reference mirroring the PyTorch module (NCHW, with conv bias)."""
  def conv3x3(z, w, b):
    y = jax.lax.conv_general_dilated(
        z, w, window_strides=(1, 1), padding=((1, 1), (1, 1)),
        dimension_numbers=('NCHW', 'OIHW', 'NCHW'))
    return y + b[None, :, None, None]

  def bn_relu(s, gamma, beta):
    mean = s.mean(axis=(0, 2, 3), keepdims=True)
    var = ((s - mean) ** 2).mean(axis=(0, 2, 3), keepdims=True)
    return jnp.maximum(
        gamma[None, :, None, None] * (s - mean) / jnp.sqrt(var + eps)
        + beta[None, :, None, None], 0.0)

  y = bn_relu(conv3x3(x, p['w1'], p['b1']), p['gamma1'], p['beta1'])
  y = bn_relu(conv3x3(y, p['w2'], p['b2']), p['gamma2'], p['beta2'])
  return x + y * mask


if __name__ == "__main__":
  B, C, H, W = 2, 8, 16, 16       # planes = 8

  key = jax.random.PRNGKey(0)
  ks = jax.random.split(key, 10)
  params = {
      'w1': 0.1 * jax.random.normal(ks[0], (C, C, 3, 3), jnp.float32),
      'b1': 0.1 * jax.random.normal(ks[1], (C,), jnp.float32),
      'w2': 0.1 * jax.random.normal(ks[2], (C, C, 3, 3), jnp.float32),
      'b2': 0.1 * jax.random.normal(ks[3], (C,), jnp.float32),
      'gamma1': 1.0 + 0.1 * jax.random.normal(ks[4], (C,), jnp.float32),
      'beta1': 0.1 * jax.random.normal(ks[5], (C,), jnp.float32),
      'gamma2': 1.0 + 0.1 * jax.random.normal(ks[6], (C,), jnp.float32),
      'beta2': 0.1 * jax.random.normal(ks[7], (C,), jnp.float32),
  }
  x = jax.random.normal(ks[8], (B, C, H, W), jnp.float32)          # NCHW
  mask = (jax.random.uniform(ks[9], (B, 1, H, W)) > 0.5).astype(jnp.float32)

  y = region_bottleneck_forward(x, mask, params)
  jax.block_until_ready(y)

  y_ref = region_bottleneck_reference(x, mask, params)
  assert y.shape == (B, C, H, W), y.shape
  err = float(jnp.max(jnp.abs(y - y_ref)))
  # Both paths run the channel-mix contractions at TPU default MXU precision
  # (bf16 multiplies, f32 accumulation); tolerance is sized for that.
  assert jnp.allclose(y, y_ref, rtol=1e-2, atol=1e-2), err

  print("KERNEL_OK")
</pallas_src>

<mosaic_0001>
module attributes {stable_mosaic.version = 11 : i64} {
  func.func @_region_bottleneck_kernel(%arg0: i32, %arg1: memref<2x8x256xf32, #tpu.memory_space<vmem>>, %arg2: memref<2x1x256xf32, #tpu.memory_space<vmem>>, %arg3: memref<9x1x256xf32, #tpu.memory_space<vmem>>, %arg4: memref<2x9x8x8xf32, #tpu.memory_space<vmem>>, %arg5: memref<8x4xf32, #tpu.memory_space<vmem>>, %arg6: memref<2x8x256xf32, #tpu.memory_space<vmem>>) attributes {dimension_semantics = [#tpu.dimension_semantics<arbitrary>], iteration_bounds = array<i64: 1>, scalar_prefetch = 0 : i64, scratch_operands = 0 : i64, tpu.core_type = #tpu.core_type<tc>, window_params = [{pipeline_mode = #tpu.pipeline_mode<synchronous>, transform_indices = @transform_0, window_bounds = array<i64: 2, 8, 256>}, {pipeline_mode = #tpu.pipeline_mode<synchronous>, transform_indices = @transform_1, window_bounds = array<i64: 2, 1, 256>}, {pipeline_mode = #tpu.pipeline_mode<synchronous>, transform_indices = @transform_2, window_bounds = array<i64: 9, 1, 256>}, {pipeline_mode = #tpu.pipeline_mode<synchronous>, transform_indices = @transform_3, window_bounds = array<i64: 2, 9, 8, 8>}, {pipeline_mode = #tpu.pipeline_mode<synchronous>, transform_indices = @transform_4, window_bounds = array<i64: 8, 4>}, {pipeline_mode = #tpu.pipeline_mode<synchronous>, transform_indices = @transform_5, window_bounds = array<i64: 2, 8, 256>}]} {
    %c0 = arith.constant 0 : index
    %c0_0 = arith.constant 0 : index
    %c0_1 = arith.constant 0 : index
    %0 = vector.load %arg1[%c0, %c0_0, %c0_1] : memref<2x8x256xf32, #tpu.memory_space<vmem>>, vector<1x8x256xf32>
    %1 = vector.shape_cast %0 : vector<1x8x256xf32> to vector<8x256xf32>
    %c1 = arith.constant 1 : index
    %c0_2 = arith.constant 0 : index
    %c0_3 = arith.constant 0 : index
    %2 = vector.load %arg1[%c1, %c0_2, %c0_3] : memref<2x8x256xf32, #tpu.memory_space<vmem>>, vector<1x8x256xf32>
    %3 = vector.shape_cast %2 : vector<1x8x256xf32> to vector<8x256xf32>
    %c0_4 = arith.constant 0 : index
    %c4 = arith.constant 4 : index
    %c0_5 = arith.constant 0 : index
    %c0_6 = arith.constant 0 : index
    %4 = vector.load %arg4[%c0_4, %c4, %c0_5, %c0_6] : memref<2x9x8x8xf32, #tpu.memory_space<vmem>>, vector<1x1x8x8xf32>
    %5 = vector.shape_cast %4 : vector<1x1x8x8xf32> to vector<8x8xf32>
    %cst = arith.constant dense<0.000000e+00> : vector<8x256xf32>
    %6 = tpu.matmul %5, %1, %cst {dimension_numbers = #tpu.dot_dimension_numbers<[1], [0], [0], [1], [0, 0, 1, 1], [], []>} : vector<8x8xf32>, vector<8x256xf32>, vector<8x256xf32> -> vector<8x256xf32>
    %c17_i32 = arith.constant 17 : i32
    %7 = tpu.dynamic_rotate %1 by %c17_i32 dim 1 : vector<8x256xf32>, i32 -> vector<8x256xf32>
    %c0_7 = arith.constant 0 : index
    %c0_8 = arith.constant 0 : index
    %c0_9 = arith.constant 0 : index
    %8 = vector.load %arg3[%c0_7, %c0_8, %c0_9] : memref<9x1x256xf32, #tpu.memory_space<vmem>>, vector<1x1x256xf32>
    %9 = vector.shape_cast %8 : vector<1x1x256xf32> to vector<1x256xf32>
    %10 = vector.broadcast %9 : vector<1x256xf32> to vector<8x256xf32>
    %11 = arith.mulf %7, %10 : vector<8x256xf32>
    %c0_10 = arith.constant 0 : index
    %c0_11 = arith.constant 0 : index
    %c0_12 = arith.constant 0 : index
    %c0_13 = arith.constant 0 : index
    %12 = vector.load %arg4[%c0_10, %c0_11, %c0_12, %c0_13] : memref<2x9x8x8xf32, #tpu.memory_space<vmem>>, vector<1x1x8x8xf32>
    %13 = vector.shape_cast %12 : vector<1x1x8x8xf32> to vector<8x8xf32>
    %cst_14 = arith.constant dense<0.000000e+00> : vector<8x256xf32>
    %14 = tpu.matmul %13, %11, %cst_14 {dimension_numbers = #tpu.dot_dimension_numbers<[1], [0], [0], [1], [0, 0, 1, 1], [], []>} : vector<8x8xf32>, vector<8x256xf32>, vector<8x256xf32> -> vector<8x256xf32>
    %15 = arith.addf %6, %14 : vector<8x256xf32>
    %c16_i32 = arith.constant 16 : i32
    %16 = tpu.dynamic_rotate %1 by %c16_i32 dim 1 : vector<8x256xf32>, i32 -> vector<8x256xf32>
    %c1_15 = arith.constant 1 : index
    %c0_16 = arith.constant 0 : index
    %c0_17 = arith.constant 0 : index
    %17 = vector.load %arg3[%c1_15, %c0_16, %c0_17] : memref<9x1x256xf32, #tpu.memory_space<vmem>>, vector<1x1x256xf32>
    %18 = vector.shape_cast %17 : vector<1x1x256xf32> to vector<1x256xf32>
    %19 = vector.broadcast %18 : vector<1x256xf32> to vector<8x256xf32>
    %20 = arith.mulf %16, %19 : vector<8x256xf32>
    %c0_18 = arith.constant 0 : index
    %c1_19 = arith.constant 1 : index
    %c0_20 = arith.constant 0 : index
    %c0_21 = arith.constant 0 : index
    %21 = vector.load %arg4[%c0_18, %c1_19, %c0_20, %c0_21] : memref<2x9x8x8xf32, #tpu.memory_space<vmem>>, vector<1x1x8x8xf32>
    %22 = vector.shape_cast %21 : vector<1x1x8x8xf32> to vector<8x8xf32>
    %cst_22 = arith.constant dense<0.000000e+00> : vector<8x256xf32>
    %23 = tpu.matmul %22, %20, %cst_22 {dimension_numbers = #tpu.dot_dimension_numbers<[1], [0], [0], [1], [0, 0, 1, 1], [], []>} : vector<8x8xf32>, vector<8x256xf32>, vector<8x256xf32> -> vector<8x256xf32>
    %24 = arith.addf %15, %23 : vector<8x256xf32>
    %c15_i32 = arith.constant 15 : i32
    %25 = tpu.dynamic_rotate %1 by %c15_i32 dim 1 : vector<8x256xf32>, i32 -> vector<8x256xf32>
    %c2 = arith.constant 2 : index
    %c0_23 = arith.constant 0 : index
    %c0_24 = arith.constant 0 : index
    %26 = vector.load %arg3[%c2, %c0_23, %c0_24] : memref<9x1x256xf32, #tpu.memory_space<vmem>>, vector<1x1x256xf32>
    %27 = vector.shape_cast %26 : vector<1x1x256xf32> to vector<1x256xf32>
    %28 = vector.broadcast %27 : vector<1x256xf32> to vector<8x256xf32>
    %29 = arith.mulf %25, %28 : vector<8x256xf32>
    %c0_25 = arith.constant 0 : index
    %c2_26 = arith.constant 2 : index
    %c0_27 = arith.constant 0 : index
    %c0_28 = arith.constant 0 : index
    %30 = vector.load %arg4[%c0_25, %c2_26, %c0_27, %c0_28] : memref<2x9x8x8xf32, #tpu.memory_space<vmem>>, vector<1x1x8x8xf32>
    %31 = vector.shape_cast %30 : vector<1x1x8x8xf32> to vector<8x8xf32>
    %cst_29 = arith.constant dense<0.000000e+00> : vector<8x256xf32>
    %32 = tpu.matmul %31, %29, %cst_29 {dimension_numbers = #tpu.dot_dimension_numbers<[1], [0], [0], [1], [0, 0, 1, 1], [], []>} : vector<8x8xf32>, vector<8x256xf32>, vector<8x256xf32> -> vector<8x256xf32>
    %33 = arith.addf %24, %32 : vector<8x256xf32>
    %c1_i32 = arith.constant 1 : i32
    %34 = tpu.dynamic_rotate %1 by %c1_i32 dim 1 : vector<8x256xf32>, i32 -> vector<8x256xf32>
    %c3 = arith.constant 3 : index
    %c0_30 = arith.constant 0 : index
    %c0_31 = arith.constant 0 : index
    %35 = vector.load %arg3[%c3, %c0_30, %c0_31] : memref<9x1x256xf32, #tpu.memory_space<vmem>>, vector<1x1x256xf32>
    %36 = vector.shape_cast %35 : vector<1x1x256xf32> to vector<1x256xf32>
    %37 = vector.broadcast %36 : vector<1x256xf32> to vector<8x256xf32>
    %38 = arith.mulf %34, %37 : vector<8x256xf32>
    %c0_32 = arith.constant 0 : index
    %c3_33 = arith.constant 3 : index
    %c0_34 = arith.constant 0 : index
    %c0_35 = arith.constant 0 : index
    %39 = vector.load %arg4[%c0_32, %c3_33, %c0_34, %c0_35] : memref<2x9x8x8xf32, #tpu.memory_space<vmem>>, vector<1x1x8x8xf32>
    %40 = vector.shape_cast %39 : vector<1x1x8x8xf32> to vector<8x8xf32>
    %cst_36 = arith.constant dense<0.000000e+00> : vector<8x256xf32>
    %41 = tpu.matmul %40, %38, %cst_36 {dimension_numbers = #tpu.dot_dimension_numbers<[1], [0], [0], [1], [0, 0, 1, 1], [], []>} : vector<8x8xf32>, vector<8x256xf32>, vector<8x256xf32> -> vector<8x256xf32>
    %42 = arith.addf %33, %41 : vector<8x256xf32>
    %c255_i32 = arith.constant 255 : i32
    %43 = tpu.dynamic_rotate %1 by %c255_i32 dim 1 : vector<8x256xf32>, i32 -> vector<8x256xf32>
    %c5 = arith.constant 5 : index
    %c0_37 = arith.constant 0 : index
    %c0_38 = arith.constant 0 : index
    %44 = vector.load %arg3[%c5, %c0_37, %c0_38] : memref<9x1x256xf32, #tpu.memory_space<vmem>>, vector<1x1x256xf32>
    %45 = vector.shape_cast %44 : vector<1x1x256xf32> to vector<1x256xf32>
    %46 = vector.broadcast %45 : vector<1x256xf32> to vector<8x256xf32>
    %47 = arith.mulf %43, %46 : vector<8x256xf32>
    %c0_39 = arith.constant 0 : index
    %c5_40 = arith.constant 5 : index
    %c0_41 = arith.constant 0 : index
    %c0_42 = arith.constant 0 : index
    %48 = vector.load %arg4[%c0_39, %c5_40, %c0_41, %c0_42] : memref<2x9x8x8xf32, #tpu.memory_space<vmem>>, vector<1x1x8x8xf32>
    %49 = vector.shape_cast %48 : vector<1x1x8x8xf32> to vector<8x8xf32>
    %cst_43 = arith.constant dense<0.000000e+00> : vector<8x256xf32>
    %50 = tpu.matmul %49, %47, %cst_43 {dimension_numbers = #tpu.dot_dimension_numbers<[1], [0], [0], [1], [0, 0, 1, 1], [], []>} : vector<8x8xf32>, vector<8x256xf32>, vector<8x256xf32> -> vector<8x256xf32>
    %51 = arith.addf %42, %50 : vector<8x256xf32>
    %c241_i32 = arith.constant 241 : i32
    %52 = tpu.dynamic_rotate %1 by %c241_i32 dim 1 : vector<8x256xf32>, i32 -> vector<8x256xf32>
    %c6 = arith.constant 6 : index
    %c0_44 = arith.constant 0 : index
    %c0_45 = arith.constant 0 : index
    %53 = vector.load %arg3[%c6, %c0_44, %c0_45] : memref<9x1x256xf32, #tpu.memory_space<vmem>>, vector<1x1x256xf32>
    %54 = vector.shape_cast %53 : vector<1x1x256xf32> to vector<1x256xf32>
    %55 = vector.broadcast %54 : vector<1x256xf32> to vector<8x256xf32>
    %56 = arith.mulf %52, %55 : vector<8x256xf32>
    %c0_46 = arith.constant 0 : index
    %c6_47 = arith.constant 6 : index
    %c0_48 = arith.constant 0 : index
    %c0_49 = arith.constant 0 : index
    %57 = vector.load %arg4[%c0_46, %c6_47, %c0_48, %c0_49] : memref<2x9x8x8xf32, #tpu.memory_space<vmem>>, vector<1x1x8x8xf32>
    %58 = vector.shape_cast %57 : vector<1x1x8x8xf32> to vector<8x8xf32>
    %cst_50 = arith.constant dense<0.000000e+00> : vector<8x256xf32>
    %59 = tpu.matmul %58, %56, %cst_50 {dimension_numbers = #tpu.dot_dimension_numbers<[1], [0], [0], [1], [0, 0, 1, 1], [], []>} : vector<8x8xf32>, vector<8x256xf32>, vector<8x256xf32> -> vector<8x256xf32>
    %60 = arith.addf %51, %59 : vector<8x256xf32>
    %c240_i32 = arith.constant 240 : i32
    %61 = tpu.dynamic_rotate %1 by %c240_i32 dim 1 : vector<8x256xf32>, i32 -> vector<8x256xf32>
    %c7 = arith.constant 7 : index
    %c0_51 = arith.constant 0 : index
    %c0_52 = arith.constant 0 : index
    %62 = vector.load %arg3[%c7, %c0_51, %c0_52] : memref<9x1x256xf32, #tpu.memory_space<vmem>>, vector<1x1x256xf32>
    %63 = vector.shape_cast %62 : vector<1x1x256xf32> to vector<1x256xf32>
    %64 = vector.broadcast %63 : vector<1x256xf32> to vector<8x256xf32>
    %65 = arith.mulf %61, %64 : vector<8x256xf32>
    %c0_53 = arith.constant 0 : index
    %c7_54 = arith.constant 7 : index
    %c0_55 = arith.constant 0 : index
    %c0_56 = arith.constant 0 : index
    %66 = vector.load %arg4[%c0_53, %c7_54, %c0_55, %c0_56] : memref<2x9x8x8xf32, #tpu.memory_space<vmem>>, vector<1x1x8x8xf32>
    %67 = vector.shape_cast %66 : vector<1x1x8x8xf32> to vector<8x8xf32>
    %cst_57 = arith.constant dense<0.000000e+00> : vector<8x256xf32>
    %68 = tpu.matmul %67, %65, %cst_57 {dimension_numbers = #tpu.dot_dimension_numbers<[1], [0], [0], [1], [0, 0, 1, 1], [], []>} : vector<8x8xf32>, vector<8x256xf32>, vector<8x256xf32> -> vector<8x256xf32>
    %69 = arith.addf %60, %68 : vector<8x256xf32>
    %c239_i32 = arith.constant 239 : i32
    %70 = tpu.dynamic_rotate %1 by %c239_i32 dim 1 : vector<8x256xf32>, i32 -> vector<8x256xf32>
    %c8 = arith.constant 8 : index
    %c0_58 = arith.constant 0 : index
    %c0_59 = arith.constant 0 : index
    %71 = vector.load %arg3[%c8, %c0_58, %c0_59] : memref<9x1x256xf32, #tpu.memory_space<vmem>>, vector<1x1x256xf32>
    %72 = vector.shape_cast %71 : vector<1x1x256xf32> to vector<1x256xf32>
    %73 = vector.broadcast %72 : vector<1x256xf32> to vector<8x256xf32>
    %74 = arith.mulf %70, %73 : vector<8x256xf32>
    %c0_60 = arith.constant 0 : index
    %c8_61 = arith.constant 8 : index
    %c0_62 = arith.constant 0 : index
    %c0_63 = arith.constant 0 : index
    %75 = vector.load %arg4[%c0_60, %c8_61, %c0_62, %c0_63] : memref<2x9x8x8xf32, #tpu.memory_space<vmem>>, vector<1x1x8x8xf32>
    %76 = vector.shape_cast %75 : vector<1x1x8x8xf32> to vector<8x8xf32>
    %cst_64 = arith.constant dense<0.000000e+00> : vector<8x256xf32>
    %77 = tpu.matmul %76, %74, %cst_64 {dimension_numbers = #tpu.dot_dimension_numbers<[1], [0], [0], [1], [0, 0, 1, 1], [], []>} : vector<8x8xf32>, vector<8x256xf32>, vector<8x256xf32> -> vector<8x256xf32>
    %78 = arith.addf %69, %77 : vector<8x256xf32>
    %c0_65 = arith.constant 0 : index
    %c4_66 = arith.constant 4 : index
    %c0_67 = arith.constant 0 : index
    %c0_68 = arith.constant 0 : index
    %79 = vector.load %arg4[%c0_65, %c4_66, %c0_67, %c0_68] : memref<2x9x8x8xf32, #tpu.memory_space<vmem>>, vector<1x1x8x8xf32>
    %80 = vector.shape_cast %79 : vector<1x1x8x8xf32> to vector<8x8xf32>
    %cst_69 = arith.constant dense<0.000000e+00> : vector<8x256xf32>
    %81 = tpu.matmul %80, %3, %cst_69 {dimension_numbers = #tpu.dot_dimension_numbers<[1], [0], [0], [1], [0, 0, 1, 1], [], []>} : vector<8x8xf32>, vector<8x256xf32>, vector<8x256xf32> -> vector<8x256xf32>
    %c17_i32_70 = arith.constant 17 : i32
    %82 = tpu.dynamic_rotate %3 by %c17_i32_70 dim 1 : vector<8x256xf32>, i32 -> vector<8x256xf32>
    %c0_71 = arith.constant 0 : index
    %c0_72 = arith.constant 0 : index
    %c0_73 = arith.constant 0 : index
    %83 = vector.load %arg3[%c0_71, %c0_72, %c0_73] : memref<9x1x256xf32, #tpu.memory_space<vmem>>, vector<1x1x256xf32>
    %84 = vector.shape_cast %83 : vector<1x1x256xf32> to vector<1x256xf32>
    %85 = vector.broadcast %84 : vector<1x256xf32> to vector<8x256xf32>
    %86 = arith.mulf %82, %85 : vector<8x256xf32>
    %c0_74 = arith.constant 0 : index
    %c0_75 = arith.constant 0 : index
    %c0_76 = arith.constant 0 : index
    %c0_77 = arith.constant 0 : index
    %87 = vector.load %arg4[%c0_74, %c0_75, %c0_76, %c0_77] : memref<2x9x8x8xf32, #tpu.memory_space<vmem>>, vector<1x1x8x8xf32>
    %88 = vector.shape_cast %87 : vector<1x1x8x8xf32> to vector<8x8xf32>
    %cst_78 = arith.constant dense<0.000000e+00> : vector<8x256xf32>
    %89 = tpu.matmul %88, %86, %cst_78 {dimension_numbers = #tpu.dot_dimension_numbers<[1], [0], [0], [1], [0, 0, 1, 1], [], []>} : vector<8x8xf32>, vector<8x256xf32>, vector<8x256xf32> -> vector<8x256xf32>
    %90 = arith.addf %81, %89 : vector<8x256xf32>
    %c16_i32_79 = arith.constant 16 : i32
    %91 = tpu.dynamic_rotate %3 by %c16_i32_79 dim 1 : vector<8x256xf32>, i32 -> vector<8x256xf32>
    %c1_80 = arith.constant 1 : index
    %c0_81 = arith.constant 0 : index
    %c0_82 = arith.constant 0 : index
    %92 = vector.load %arg3[%c1_80, %c0_81, %c0_82] : memref<9x1x256xf32, #tpu.memory_space<vmem>>, vector<1x1x256xf32>
    %93 = vector.shape_cast %92 : vector<1x1x256xf32> to vector<1x256xf32>
    %94 = vector.broadcast %93 : vector<1x256xf32> to vector<8x256xf32>
    %95 = arith.mulf %91, %94 : vector<8x256xf32>
    %c0_83 = arith.constant 0 : index
    %c1_84 = arith.constant 1 : index
    %c0_85 = arith.constant 0 : index
    %c0_86 = arith.constant 0 : index
    %96 = vector.load %arg4[%c0_83, %c1_84, %c0_85, %c0_86] : memref<2x9x8x8xf32, #tpu.memory_space<vmem>>, vector<1x1x8x8xf32>
    %97 = vector.shape_cast %96 : vector<1x1x8x8xf32> to vector<8x8xf32>
    %cst_87 = arith.constant dense<0.000000e+00> : vector<8x256xf32>
    %98 = tpu.matmul %97, %95, %cst_87 {dimension_numbers = #tpu.dot_dimension_numbers<[1], [0], [0], [1], [0, 0, 1, 1], [], []>} : vector<8x8xf32>, vector<8x256xf32>, vector<8x256xf32> -> vector<8x256xf32>
    %99 = arith.addf %90, %98 : vector<8x256xf32>
    %c15_i32_88 = arith.constant 15 : i32
    %100 = tpu.dynamic_rotate %3 by %c15_i32_88 dim 1 : vector<8x256xf32>, i32 -> vector<8x256xf32>
    %c2_89 = arith.constant 2 : index
    %c0_90 = arith.constant 0 : index
    %c0_91 = arith.constant 0 : index
    %101 = vector.load %arg3[%c2_89, %c0_90, %c0_91] : memref<9x1x256xf32, #tpu.memory_space<vmem>>, vector<1x1x256xf32>
    %102 = vector.shape_cast %101 : vector<1x1x256xf32> to vector<1x256xf32>
    %103 = vector.broadcast %102 : vector<1x256xf32> to vector<8x256xf32>
    %104 = arith.mulf %100, %103 : vector<8x256xf32>
    %c0_92 = arith.constant 0 : index
    %c2_93 = arith.constant 2 : index
    %c0_94 = arith.constant 0 : index
    %c0_95 = arith.constant 0 : index
    %105 = vector.load %arg4[%c0_92, %c2_93, %c0_94, %c0_95] : memref<2x9x8x8xf32, #tpu.memory_space<vmem>>, vector<1x1x8x8xf32>
    %106 = vector.shape_cast %105 : vector<1x1x8x8xf32> to vector<8x8xf32>
    %cst_96 = arith.constant dense<0.000000e+00> : vector<8x256xf32>
    %107 = tpu.matmul %106, %104, %cst_96 {dimension_numbers = #tpu.dot_dimension_numbers<[1], [0], [0], [1], [0, 0, 1, 1], [], []>} : vector<8x8xf32>, vector<8x256xf32>, vector<8x256xf32> -> vector<8x256xf32>
    %108 = arith.addf %99, %107 : vector<8x256xf32>
    %c1_i32_97 = arith.constant 1 : i32
    %109 = tpu.dynamic_rotate %3 by %c1_i32_97 dim 1 : vector<8x256xf32>, i32 -> vector<8x256xf32>
    %c3_98 = arith.constant 3 : index
    %c0_99 = arith.constant 0 : index
    %c0_100 = arith.constant 0 : index
    %110 = vector.load %arg3[%c3_98, %c0_99, %c0_100] : memref<9x1x256xf32, #tpu.memory_space<vmem>>, vector<1x1x256xf32>
    %111 = vector.shape_cast %110 : vector<1x1x256xf32> to vector<1x256xf32>
    %112 = vector.broadcast %111 : vector<1x256xf32> to vector<8x256xf32>
    %113 = arith.mulf %109, %112 : vector<8x256xf32>
    %c0_101 = arith.constant 0 : index
    %c3_102 = arith.constant 3 : index
    %c0_103 = arith.constant 0 : index
    %c0_104 = arith.constant 0 : index
    %114 = vector.load %arg4[%c0_101, %c3_102, %c0_103, %c0_104] : memref<2x9x8x8xf32, #tpu.memory_space<vmem>>, vector<1x1x8x8xf32>
    %115 = vector.shape_cast %114 : vector<1x1x8x8xf32> to vector<8x8xf32>
    %cst_105 = arith.constant dense<0.000000e+00> : vector<8x256xf32>
    %116 = tpu.matmul %115, %113, %cst_105 {dimension_numbers = #tpu.dot_dimension_numbers<[1], [0], [0], [1], [0, 0, 1, 1], [], []>} : vector<8x8xf32>, vector<8x256xf32>, vector<8x256xf32> -> vector<8x256xf32>
    %117 = arith.addf %108, %116 : vector<8x256xf32>
    %c255_i32_106 = arith.constant 255 : i32
    %118 = tpu.dynamic_rotate %3 by %c255_i32_106 dim 1 : vector<8x256xf32>, i32 -> vector<8x256xf32>
    %c5_107 = arith.constant 5 : index
    %c0_108 = arith.constant 0 : index
    %c0_109 = arith.constant 0 : index
    %119 = vector.load %arg3[%c5_107, %c0_108, %c0_109] : memref<9x1x256xf32, #tpu.memory_space<vmem>>, vector<1x1x256xf32>
    %120 = vector.shape_cast %119 : vector<1x1x256xf32> to vector<1x256xf32>
    %121 = vector.broadcast %120 : vector<1x256xf32> to vector<8x256xf32>
    %122 = arith.mulf %118, %121 : vector<8x256xf32>
    %c0_110 = arith.constant 0 : index
    %c5_111 = arith.constant 5 : index
    %c0_112 = arith.constant 0 : index
    %c0_113 = arith.constant 0 : index
    %123 = vector.load %arg4[%c0_110, %c5_111, %c0_112, %c0_113] : memref<2x9x8x8xf32, #tpu.memory_space<vmem>>, vector<1x1x8x8xf32>
    %124 = vector.shape_cast %123 : vector<1x1x8x8xf32> to vector<8x8xf32>
    %cst_114 = arith.constant dense<0.000000e+00> : vector<8x256xf32>
    %125 = tpu.matmul %124, %122, %cst_114 {dimension_numbers = #tpu.dot_dimension_numbers<[1], [0], [0], [1], [0, 0, 1, 1], [], []>} : vector<8x8xf32>, vector<8x256xf32>, vector<8x256xf32> -> vector<8x256xf32>
    %126 = arith.addf %117, %125 : vector<8x256xf32>
    %c241_i32_115 = arith.constant 241 : i32
    %127 = tpu.dynamic_rotate %3 by %c241_i32_115 dim 1 : vector<8x256xf32>, i32 -> vector<8x256xf32>
    %c6_116 = arith.constant 6 : index
    %c0_117 = arith.constant 0 : index
    %c0_118 = arith.constant 0 : index
    %128 = vector.load %arg3[%c6_116, %c0_117, %c0_118] : memref<9x1x256xf32, #tpu.memory_space<vmem>>, vector<1x1x256xf32>
    %129 = vector.shape_cast %128 : vector<1x1x256xf32> to vector<1x256xf32>
    %130 = vector.broadcast %129 : vector<1x256xf32> to vector<8x256xf32>
    %131 = arith.mulf %127, %130 : vector<8x256xf32>
    %c0_119 = arith.constant 0 : index
    %c6_120 = arith.constant 6 : index
    %c0_121 = arith.constant 0 : index
    %c0_122 = arith.constant 0 : index
    %132 = vector.load %arg4[%c0_119, %c6_120, %c0_121, %c0_122] : memref<2x9x8x8xf32, #tpu.memory_space<vmem>>, vector<1x1x8x8xf32>
    %133 = vector.shape_cast %132 : vector<1x1x8x8xf32> to vector<8x8xf32>
    %cst_123 = arith.constant dense<0.000000e+00> : vector<8x256xf32>
    %134 = tpu.matmul %133, %131, %cst_123 {dimension_numbers = #tpu.dot_dimension_numbers<[1], [0], [0], [1], [0, 0, 1, 1], [], []>} : vector<8x8xf32>, vector<8x256xf32>, vector<8x256xf32> -> vector<8x256xf32>
    %135 = arith.addf %126, %134 : vector<8x256xf32>
    %c240_i32_124 = arith.constant 240 : i32
    %136 = tpu.dynamic_rotate %3 by %c240_i32_124 dim 1 : vector<8x256xf32>, i32 -> vector<8x256xf32>
    %c7_125 = arith.constant 7 : index
    %c0_126 = arith.constant 0 : index
    %c0_127 = arith.constant 0 : index
    %137 = vector.load %arg3[%c7_125, %c0_126, %c0_127] : memref<9x1x256xf32, #tpu.memory_space<vmem>>, vector<1x1x256xf32>
    %138 = vector.shape_cast %137 : vector<1x1x256xf32> to vector<1x256xf32>
    %139 = vector.broadcast %138 : vector<1x256xf32> to vector<8x256xf32>
    %140 = arith.mulf %136, %139 : vector<8x256xf32>
    %c0_128 = arith.constant 0 : index
    %c7_129 = arith.constant 7 : index
    %c0_130 = arith.constant 0 : index
    %c0_131 = arith.constant 0 : index
    %141 = vector.load %arg4[%c0_128, %c7_129, %c0_130, %c0_131] : memref<2x9x8x8xf32, #tpu.memory_space<vmem>>, vector<1x1x8x8xf32>
    %142 = vector.shape_cast %141 : vector<1x1x8x8xf32> to vector<8x8xf32>
    %cst_132 = arith.constant dense<0.000000e+00> : vector<8x256xf32>
    %143 = tpu.matmul %142, %140, %cst_132 {dimension_numbers = #tpu.dot_dimension_numbers<[1], [0], [0], [1], [0, 0, 1, 1], [], []>} : vector<8x8xf32>, vector<8x256xf32>, vector<8x256xf32> -> vector<8x256xf32>
    %144 = arith.addf %135, %143 : vector<8x256xf32>
    %c239_i32_133 = arith.constant 239 : i32
    %145 = tpu.dynamic_rotate %3 by %c239_i32_133 dim 1 : vector<8x256xf32>, i32 -> vector<8x256xf32>
    %c8_134 = arith.constant 8 : index
    %c0_135 = arith.constant 0 : index
    %c0_136 = arith.constant 0 : index
    %146 = vector.load %arg3[%c8_134, %c0_135, %c0_136] : memref<9x1x256xf32, #tpu.memory_space<vmem>>, vector<1x1x256xf32>
    %147 = vector.shape_cast %146 : vector<1x1x256xf32> to vector<1x256xf32>
    %148 = vector.broadcast %147 : vector<1x256xf32> to vector<8x256xf32>
    %149 = arith.mulf %145, %148 : vector<8x256xf32>
    %c0_137 = arith.constant 0 : index
    %c8_138 = arith.constant 8 : index
    %c0_139 = arith.constant 0 : index
    %c0_140 = arith.constant 0 : index
    %150 = vector.load %arg4[%c0_137, %c8_138, %c0_139, %c0_140] : memref<2x9x8x8xf32, #tpu.memory_space<vmem>>, vector<1x1x8x8xf32>
    %151 = vector.shape_cast %150 : vector<1x1x8x8xf32> to vector<8x8xf32>
    %cst_141 = arith.constant dense<0.000000e+00> : vector<8x256xf32>
    %152 = tpu.matmul %151, %149, %cst_141 {dimension_numbers = #tpu.dot_dimension_numbers<[1], [0], [0], [1], [0, 0, 1, 1], [], []>} : vector<8x8xf32>, vector<8x256xf32>, vector<8x256xf32> -> vector<8x256xf32>
    %153 = arith.addf %144, %152 : vector<8x256xf32>
    %c0_142 = arith.constant 0 : index
    %c0_143 = arith.constant 0 : index
    %154 = vector.load %arg5[%c0_142, %c0_143] : memref<8x4xf32, #tpu.memory_space<vmem>>, vector<8x1xf32>
    %c0_144 = arith.constant 0 : index
    %c1_145 = arith.constant 1 : index
    %155 = vector.load %arg5[%c0_144, %c1_145] : memref<8x4xf32, #tpu.memory_space<vmem>>, vector<8x1xf32>
    %156 = arith.mulf %78, %78 : vector<8x256xf32>
    %157 = arith.addf %78, %153 : vector<8x256xf32>
    %158 = arith.mulf %153, %153 : vector<8x256xf32>
    %159 = arith.addf %156, %158 : vector<8x256xf32>
    %cst_146 = arith.constant dense<0.000000e+00> : vector<8xf32>
    %160 = vector.multi_reduction <add>, %157, %cst_146 [1] : vector<8x256xf32> to vector<8xf32>
    %161 = vector.shape_cast %160 : vector<8xf32> to vector<8x1xf32>
    %cst_147 = arith.constant 0.001953125 : f32
    %162 = vector.broadcast %cst_147 : f32 to vector<8x1xf32>
    %163 = arith.mulf %161, %162 : vector<8x1xf32>
    %cst_148 = arith.constant dense<0.000000e+00> : vector<8xf32>
    %164 = vector.multi_reduction <add>, %159, %cst_148 [1] : vector<8x256xf32> to vector<8xf32>
    %165 = vector.shape_cast %164 : vector<8xf32> to vector<8x1xf32>
    %cst_149 = arith.constant 0.001953125 : f32
    %166 = vector.broadcast %cst_149 : f32 to vector<8x1xf32>
    %167 = arith.mulf %165, %166 : vector<8x1xf32>
    %168 = arith.mulf %163, %163 : vector<8x1xf32>
    %169 = arith.subf %167, %168 : vector<8x1xf32>
    %cst_150 = arith.constant 0.000000e+00 : f32
    %170 = vector.broadcast %cst_150 : f32 to vector<8x1xf32>
    %171 = arith.maximumf %169, %170 : vector<8x1xf32>
    %cst_151 = arith.constant 9.99999974E-6 : f32
    %172 = vector.broadcast %cst_151 : f32 to vector<8x1xf32>
    %173 = arith.addf %171, %172 : vector<8x1xf32>
    %174 = math.rsqrt %173 : vector<8x1xf32>
    %175 = vector.broadcast %163 : vector<8x1xf32> to vector<8x256xf32>
    %176 = arith.subf %78, %175 : vector<8x256xf32>
    %177 = vector.broadcast %174 : vector<8x1xf32> to vector<8x256xf32>
    %178 = arith.mulf %176, %177 : vector<8x256xf32>
    %179 = vector.broadcast %154 : vector<8x1xf32> to vector<8x256xf32>
    %180 = arith.mulf %179, %178 : vector<8x256xf32>
    %181 = vector.broadcast %155 : vector<8x1xf32> to vector<8x256xf32>
    %182 = arith.addf %180, %181 : vector<8x256xf32>
    %cst_152 = arith.constant 0.000000e+00 : f32
    %183 = vector.broadcast %cst_152 : f32 to vector<8x256xf32>
    %184 = arith.maximumf %182, %183 : vector<8x256xf32>
    %185 = vector.broadcast %163 : vector<8x1xf32> to vector<8x256xf32>
    %186 = arith.subf %153, %185 : vector<8x256xf32>
    %187 = vector.broadcast %174 : vector<8x1xf32> to vector<8x256xf32>
    %188 = arith.mulf %186, %187 : vector<8x256xf32>
    %189 = vector.broadcast %154 : vector<8x1xf32> to vector<8x256xf32>
    %190 = arith.mulf %189, %188 : vector<8x256xf32>
    %191 = vector.broadcast %155 : vector<8x1xf32> to vector<8x256xf32>
    %192 = arith.addf %190, %191 : vector<8x256xf32>
    %cst_153 = arith.constant 0.000000e+00 : f32
    %193 = vector.broadcast %cst_153 : f32 to vector<8x256xf32>
    %194 = arith.maximumf %192, %193 : vector<8x256xf32>
    %c1_154 = arith.constant 1 : index
    %c4_155 = arith.constant 4 : index
    %c0_156 = arith.constant 0 : index
    %c0_157 = arith.constant 0 : index
    %195 = vector.load %arg4[%c1_154, %c4_155, %c0_156, %c0_157] : memref<2x9x8x8xf32, #tpu.memory_space<vmem>>, vector<1x1x8x8xf32>
    %196 = vector.shape_cast %195 : vector<1x1x8x8xf32> to vector<8x8xf32>
    %cst_158 = arith.constant dense<0.000000e+00> : vector<8x256xf32>
    %197 = tpu.matmul %196, %184, %cst_158 {dimension_numbers = #tpu.dot_dimension_numbers<[1], [0], [0], [1], [0, 0, 1, 1], [], []>} : vector<8x8xf32>, vector<8x256xf32>, vector<8x256xf32> -> vector<8x256xf32>
    %c17_i32_159 = arith.constant 17 : i32
    %198 = tpu.dynamic_rotate %184 by %c17_i32_159 dim 1 : vector<8x256xf32>, i32 -> vector<8x256xf32>
    %c0_160 = arith.constant 0 : index
    %c0_161 = arith.constant 0 : index
    %c0_162 = arith.constant 0 : index
    %199 = vector.load %arg3[%c0_160, %c0_161, %c0_162] : memref<9x1x256xf32, #tpu.memory_space<vmem>>, vector<1x1x256xf32>
    %200 = vector.shape_cast %199 : vector<1x1x256xf32> to vector<1x256xf32>
    %201 = vector.broadcast %200 : vector<1x256xf32> to vector<8x256xf32>
    %202 = arith.mulf %198, %201 : vector<8x256xf32>
    %c1_163 = arith.constant 1 : index
    %c0_164 = arith.constant 0 : index
    %c0_165 = arith.constant 0 : index
    %c0_166 = arith.constant 0 : index
    %203 = vector.load %arg4[%c1_163, %c0_164, %c0_165, %c0_166] : memref<2x9x8x8xf32, #tpu.memory_space<vmem>>, vector<1x1x8x8xf32>
    %204 = vector.shape_cast %203 : vector<1x1x8x8xf32> to vector<8x8xf32>
    %cst_167 = arith.constant dense<0.000000e+00> : vector<8x256xf32>
    %205 = tpu.matmul %204, %202, %cst_167 {dimension_numbers = #tpu.dot_dimension_numbers<[1], [0], [0], [1], [0, 0, 1, 1], [], []>} : vector<8x8xf32>, vector<8x256xf32>, vector<8x256xf32> -> vector<8x256xf32>
    %206 = arith.addf %197, %205 : vector<8x256xf32>
    %c16_i32_168 = arith.constant 16 : i32
    %207 = tpu.dynamic_rotate %184 by %c16_i32_168 dim 1 : vector<8x256xf32>, i32 -> vector<8x256xf32>
    %c1_169 = arith.constant 1 : index
    %c0_170 = arith.constant 0 : index
    %c0_171 = arith.constant 0 : index
    %208 = vector.load %arg3[%c1_169, %c0_170, %c0_171] : memref<9x1x256xf32, #tpu.memory_space<vmem>>, vector<1x1x256xf32>
    %209 = vector.shape_cast %208 : vector<1x1x256xf32> to vector<1x256xf32>
    %210 = vector.broadcast %209 : vector<1x256xf32> to vector<8x256xf32>
    %211 = arith.mulf %207, %210 : vector<8x256xf32>
    %c1_172 = arith.constant 1 : index
    %c1_173 = arith.constant 1 : index
    %c0_174 = arith.constant 0 : index
    %c0_175 = arith.constant 0 : index
    %212 = vector.load %arg4[%c1_172, %c1_173, %c0_174, %c0_175] : memref<2x9x8x8xf32, #tpu.memory_space<vmem>>, vector<1x1x8x8xf32>
    %213 = vector.shape_cast %212 : vector<1x1x8x8xf32> to vector<8x8xf32>
    %cst_176 = arith.constant dense<0.000000e+00> : vector<8x256xf32>
    %214 = tpu.matmul %213, %211, %cst_176 {dimension_numbers = #tpu.dot_dimension_numbers<[1], [0], [0], [1], [0, 0, 1, 1], [], []>} : vector<8x8xf32>, vector<8x256xf32>, vector<8x256xf32> -> vector<8x256xf32>
    %215 = arith.addf %206, %214 : vector<8x256xf32>
    %c15_i32_177 = arith.constant 15 : i32
    %216 = tpu.dynamic_rotate %184 by %c15_i32_177 dim 1 : vector<8x256xf32>, i32 -> vector<8x256xf32>
    %c2_178 = arith.constant 2 : index
    %c0_179 = arith.constant 0 : index
    %c0_180 = arith.constant 0 : index
    %217 = vector.load %arg3[%c2_178, %c0_179, %c0_180] : memref<9x1x256xf32, #tpu.memory_space<vmem>>, vector<1x1x256xf32>
    %218 = vector.shape_cast %217 : vector<1x1x256xf32> to vector<1x256xf32>
    %219 = vector.broadcast %218 : vector<1x256xf32> to vector<8x256xf32>
    %220 = arith.mulf %216, %219 : vector<8x256xf32>
    %c1_181 = arith.constant 1 : index
    %c2_182 = arith.constant 2 : index
    %c0_183 = arith.constant 0 : index
    %c0_184 = arith.constant 0 : index
    %221 = vector.load %arg4[%c1_181, %c2_182, %c0_183, %c0_184] : memref<2x9x8x8xf32, #tpu.memory_space<vmem>>, vector<1x1x8x8xf32>
    %222 = vector.shape_cast %221 : vector<1x1x8x8xf32> to vector<8x8xf32>
    %cst_185 = arith.constant dense<0.000000e+00> : vector<8x256xf32>
    %223 = tpu.matmul %222, %220, %cst_185 {dimension_numbers = #tpu.dot_dimension_numbers<[1], [0], [0], [1], [0, 0, 1, 1], [], []>} : vector<8x8xf32>, vector<8x256xf32>, vector<8x256xf32> -> vector<8x256xf32>
    %224 = arith.addf %215, %223 : vector<8x256xf32>
    %c1_i32_186 = arith.constant 1 : i32
    %225 = tpu.dynamic_rotate %184 by %c1_i32_186 dim 1 : vector<8x256xf32>, i32 -> vector<8x256xf32>
    %c3_187 = arith.constant 3 : index
    %c0_188 = arith.constant 0 : index
    %c0_189 = arith.constant 0 : index
    %226 = vector.load %arg3[%c3_187, %c0_188, %c0_189] : memref<9x1x256xf32, #tpu.memory_space<vmem>>, vector<1x1x256xf32>
    %227 = vector.shape_cast %226 : vector<1x1x256xf32> to vector<1x256xf32>
    %228 = vector.broadcast %227 : vector<1x256xf32> to vector<8x256xf32>
    %229 = arith.mulf %225, %228 : vector<8x256xf32>
    %c1_190 = arith.constant 1 : index
    %c3_191 = arith.constant 3 : index
    %c0_192 = arith.constant 0 : index
    %c0_193 = arith.constant 0 : index
    %230 = vector.load %arg4[%c1_190, %c3_191, %c0_192, %c0_193] : memref<2x9x8x8xf32, #tpu.memory_space<vmem>>, vector<1x1x8x8xf32>
    %231 = vector.shape_cast %230 : vector<1x1x8x8xf32> to vector<8x8xf32>
    %cst_194 = arith.constant dense<0.000000e+00> : vector<8x256xf32>
    %232 = tpu.matmul %231, %229, %cst_194 {dimension_numbers = #tpu.dot_dimension_numbers<[1], [0], [0], [1], [0, 0, 1, 1], [], []>} : vector<8x8xf32>, vector<8x256xf32>, vector<8x256xf32> -> vector<8x256xf32>
    %233 = arith.addf %224, %232 : vector<8x256xf32>
    %c255_i32_195 = arith.constant 255 : i32
    %234 = tpu.dynamic_rotate %184 by %c255_i32_195 dim 1 : vector<8x256xf32>, i32 -> vector<8x256xf32>
    %c5_196 = arith.constant 5 : index
    %c0_197 = arith.constant 0 : index
    %c0_198 = arith.constant 0 : index
    %235 = vector.load %arg3[%c5_196, %c0_197, %c0_198] : memref<9x1x256xf32, #tpu.memory_space<vmem>>, vector<1x1x256xf32>
    %236 = vector.shape_cast %235 : vector<1x1x256xf32> to vector<1x256xf32>
    %237 = vector.broadcast %236 : vector<1x256xf32> to vector<8x256xf32>
    %238 = arith.mulf %234, %237 : vector<8x256xf32>
    %c1_199 = arith.constant 1 : index
    %c5_200 = arith.constant 5 : index
    %c0_201 = arith.constant 0 : index
    %c0_202 = arith.constant 0 : index
    %239 = vector.load %arg4[%c1_199, %c5_200, %c0_201, %c0_202] : memref<2x9x8x8xf32, #tpu.memory_space<vmem>>, vector<1x1x8x8xf32>
    %240 = vector.shape_cast %239 : vector<1x1x8x8xf32> to vector<8x8xf32>
    %cst_203 = arith.constant dense<0.000000e+00> : vector<8x256xf32>
    %241 = tpu.matmul %240, %238, %cst_203 {dimension_numbers = #tpu.dot_dimension_numbers<[1], [0], [0], [1], [0, 0, 1, 1], [], []>} : vector<8x8xf32>, vector<8x256xf32>, vector<8x256xf32> -> vector<8x256xf32>
    %242 = arith.addf %233, %241 : vector<8x256xf32>
    %c241_i32_204 = arith.constant 241 : i32
    %243 = tpu.dynamic_rotate %184 by %c241_i32_204 dim 1 : vector<8x256xf32>, i32 -> vector<8x256xf32>
    %c6_205 = arith.constant 6 : index
    %c0_206 = arith.constant 0 : index
    %c0_207 = arith.constant 0 : index
    %244 = vector.load %arg3[%c6_205, %c0_206, %c0_207] : memref<9x1x256xf32, #tpu.memory_space<vmem>>, vector<1x1x256xf32>
    %245 = vector.shape_cast %244 : vector<1x1x256xf32> to vector<1x256xf32>
    %246 = vector.broadcast %245 : vector<1x256xf32> to vector<8x256xf32>
    %247 = arith.mulf %243, %246 : vector<8x256xf32>
    %c1_208 = arith.constant 1 : index
    %c6_209 = arith.constant 6 : index
    %c0_210 = arith.constant 0 : index
    %c0_211 = arith.constant 0 : index
    %248 = vector.load %arg4[%c1_208, %c6_209, %c0_210, %c0_211] : memref<2x9x8x8xf32, #tpu.memory_space<vmem>>, vector<1x1x8x8xf32>
    %249 = vector.shape_cast %248 : vector<1x1x8x8xf32> to vector<8x8xf32>
    %cst_212 = arith.constant dense<0.000000e+00> : vector<8x256xf32>
    %250 = tpu.matmul %249, %247, %cst_212 {dimension_numbers = #tpu.dot_dimension_numbers<[1], [0], [0], [1], [0, 0, 1, 1], [], []>} : vector<8x8xf32>, vector<8x256xf32>, vector<8x256xf32> -> vector<8x256xf32>
    %251 = arith.addf %242, %250 : vector<8x256xf32>
    %c240_i32_213 = arith.constant 240 : i32
    %252 = tpu.dynamic_rotate %184 by %c240_i32_213 dim 1 : vector<8x256xf32>, i32 -> vector<8x256xf32>
    %c7_214 = arith.constant 7 : index
    %c0_215 = arith.constant 0 : index
    %c0_216 = arith.constant 0 : index
    %253 = vector.load %arg3[%c7_214, %c0_215, %c0_216] : memref<9x1x256xf32, #tpu.memory_space<vmem>>, vector<1x1x256xf32>
    %254 = vector.shape_cast %253 : vector<1x1x256xf32> to vector<1x256xf32>
    %255 = vector.broadcast %254 : vector<1x256xf32> to vector<8x256xf32>
    %256 = arith.mulf %252, %255 : vector<8x256xf32>
    %c1_217 = arith.constant 1 : index
    %c7_218 = arith.constant 7 : index
    %c0_219 = arith.constant 0 : index
    %c0_220 = arith.constant 0 : index
    %257 = vector.load %arg4[%c1_217, %c7_218, %c0_219, %c0_220] : memref<2x9x8x8xf32, #tpu.memory_space<vmem>>, vector<1x1x8x8xf32>
    %258 = vector.shape_cast %257 : vector<1x1x8x8xf32> to vector<8x8xf32>
    %cst_221 = arith.constant dense<0.000000e+00> : vector<8x256xf32>
    %259 = tpu.matmul %258, %256, %cst_221 {dimension_numbers = #tpu.dot_dimension_numbers<[1], [0], [0], [1], [0, 0, 1, 1], [], []>} : vector<8x8xf32>, vector<8x256xf32>, vector<8x256xf32> -> vector<8x256xf32>
    %260 = arith.addf %251, %259 : vector<8x256xf32>
    %c239_i32_222 = arith.constant 239 : i32
    %261 = tpu.dynamic_rotate %184 by %c239_i32_222 dim 1 : vector<8x256xf32>, i32 -> vector<8x256xf32>
    %c8_223 = arith.constant 8 : index
    %c0_224 = arith.constant 0 : index
    %c0_225 = arith.constant 0 : index
    %262 = vector.load %arg3[%c8_223, %c0_224, %c0_225] : memref<9x1x256xf32, #tpu.memory_space<vmem>>, vector<1x1x256xf32>
    %263 = vector.shape_cast %262 : vector<1x1x256xf32> to vector<1x256xf32>
    %264 = vector.broadcast %263 : vector<1x256xf32> to vector<8x256xf32>
    %265 = arith.mulf %261, %264 : vector<8x256xf32>
    %c1_226 = arith.constant 1 : index
    %c8_227 = arith.constant 8 : index
    %c0_228 = arith.constant 0 : index
    %c0_229 = arith.constant 0 : index
    %266 = vector.load %arg4[%c1_226, %c8_227, %c0_228, %c0_229] : memref<2x9x8x8xf32, #tpu.memory_space<vmem>>, vector<1x1x8x8xf32>
    %267 = vector.shape_cast %266 : vector<1x1x8x8xf32> to vector<8x8xf32>
    %cst_230 = arith.constant dense<0.000000e+00> : vector<8x256xf32>
    %268 = tpu.matmul %267, %265, %cst_230 {dimension_numbers = #tpu.dot_dimension_numbers<[1], [0], [0], [1], [0, 0, 1, 1], [], []>} : vector<8x8xf32>, vector<8x256xf32>, vector<8x256xf32> -> vector<8x256xf32>
    %269 = arith.addf %260, %268 : vector<8x256xf32>
    %c1_231 = arith.constant 1 : index
    %c4_232 = arith.constant 4 : index
    %c0_233 = arith.constant 0 : index
    %c0_234 = arith.constant 0 : index
    %270 = vector.load %arg4[%c1_231, %c4_232, %c0_233, %c0_234] : memref<2x9x8x8xf32, #tpu.memory_space<vmem>>, vector<1x1x8x8xf32>
    %271 = vector.shape_cast %270 : vector<1x1x8x8xf32> to vector<8x8xf32>
    %cst_235 = arith.constant dense<0.000000e+00> : vector<8x256xf32>
    %272 = tpu.matmul %271, %194, %cst_235 {dimension_numbers = #tpu.dot_dimension_numbers<[1], [0], [0], [1], [0, 0, 1, 1], [], []>} : vector<8x8xf32>, vector<8x256xf32>, vector<8x256xf32> -> vector<8x256xf32>
    %c17_i32_236 = arith.constant 17 : i32
    %273 = tpu.dynamic_rotate %194 by %c17_i32_236 dim 1 : vector<8x256xf32>, i32 -> vector<8x256xf32>
    %c0_237 = arith.constant 0 : index
    %c0_238 = arith.constant 0 : index
    %c0_239 = arith.constant 0 : index
    %274 = vector.load %arg3[%c0_237, %c0_238, %c0_239] : memref<9x1x256xf32, #tpu.memory_space<vmem>>, vector<1x1x256xf32>
    %275 = vector.shape_cast %274 : vector<1x1x256xf32> to vector<1x256xf32>
    %276 = vector.broadcast %275 : vector<1x256xf32> to vector<8x256xf32>
    %277 = arith.mulf %273, %276 : vector<8x256xf32>
    %c1_240 = arith.constant 1 : index
    %c0_241 = arith.constant 0 : index
    %c0_242 = arith.constant 0 : index
    %c0_243 = arith.constant 0 : index
    %278 = vector.load %arg4[%c1_240, %c0_241, %c0_242, %c0_243] : memref<2x9x8x8xf32, #tpu.memory_space<vmem>>, vector<1x1x8x8xf32>
    %279 = vector.shape_cast %278 : vector<1x1x8x8xf32> to vector<8x8xf32>
    %cst_244 = arith.constant dense<0.000000e+00> : vector<8x256xf32>
    %280 = tpu.matmul %279, %277, %cst_244 {dimension_numbers = #tpu.dot_dimension_numbers<[1], [0], [0], [1], [0, 0, 1, 1], [], []>} : vector<8x8xf32>, vector<8x256xf32>, vector<8x256xf32> -> vector<8x256xf32>
    %281 = arith.addf %272, %280 : vector<8x256xf32>
    %c16_i32_245 = arith.constant 16 : i32
    %282 = tpu.dynamic_rotate %194 by %c16_i32_245 dim 1 : vector<8x256xf32>, i32 -> vector<8x256xf32>
    %c1_246 = arith.constant 1 : index
    %c0_247 = arith.constant 0 : index
    %c0_248 = arith.constant 0 : index
    %283 = vector.load %arg3[%c1_246, %c0_247, %c0_248] : memref<9x1x256xf32, #tpu.memory_space<vmem>>, vector<1x1x256xf32>
    %284 = vector.shape_cast %283 : vector<1x1x256xf32> to vector<1x256xf32>
    %285 = vector.broadcast %284 : vector<1x256xf32> to vector<8x256xf32>
    %286 = arith.mulf %282, %285 : vector<8x256xf32>
    %c1_249 = arith.constant 1 : index
    %c1_250 = arith.constant 1 : index
    %c0_251 = arith.constant 0 : index
    %c0_252 = arith.constant 0 : index
    %287 = vector.load %arg4[%c1_249, %c1_250, %c0_251, %c0_252] : memref<2x9x8x8xf32, #tpu.memory_space<vmem>>, vector<1x1x8x8xf32>
    %288 = vector.shape_cast %287 : vector<1x1x8x8xf32> to vector<8x8xf32>
    %cst_253 = arith.constant dense<0.000000e+00> : vector<8x256xf32>
    %289 = tpu.matmul %288, %286, %cst_253 {dimension_numbers = #tpu.dot_dimension_numbers<[1], [0], [0], [1], [0, 0, 1, 1], [], []>} : vector<8x8xf32>, vector<8x256xf32>, vector<8x256xf32> -> vector<8x256xf32>
    %290 = arith.addf %281, %289 : vector<8x256xf32>
    %c15_i32_254 = arith.constant 15 : i32
    %291 = tpu.dynamic_rotate %194 by %c15_i32_254 dim 1 : vector<8x256xf32>, i32 -> vector<8x256xf32>
    %c2_255 = arith.constant 2 : index
    %c0_256 = arith.constant 0 : index
    %c0_257 = arith.constant 0 : index
    %292 = vector.load %arg3[%c2_255, %c0_256, %c0_257] : memref<9x1x256xf32, #tpu.memory_space<vmem>>, vector<1x1x256xf32>
    %293 = vector.shape_cast %292 : vector<1x1x256xf32> to vector<1x256xf32>
    %294 = vector.broadcast %293 : vector<1x256xf32> to vector<8x256xf32>
    %295 = arith.mulf %291, %294 : vector<8x256xf32>
    %c1_258 = arith.constant 1 : index
    %c2_259 = arith.constant 2 : index
    %c0_260 = arith.constant 0 : index
    %c0_261 = arith.constant 0 : index
    %296 = vector.load %arg4[%c1_258, %c2_259, %c0_260, %c0_261] : memref<2x9x8x8xf32, #tpu.memory_space<vmem>>, vector<1x1x8x8xf32>
    %297 = vector.shape_cast %296 : vector<1x1x8x8xf32> to vector<8x8xf32>
    %cst_262 = arith.constant dense<0.000000e+00> : vector<8x256xf32>
    %298 = tpu.matmul %297, %295, %cst_262 {dimension_numbers = #tpu.dot_dimension_numbers<[1], [0], [0], [1], [0, 0, 1, 1], [], []>} : vector<8x8xf32>, vector<8x256xf32>, vector<8x256xf32> -> vector<8x256xf32>
    %299 = arith.addf %290, %298 : vector<8x256xf32>
    %c1_i32_263 = arith.constant 1 : i32
    %300 = tpu.dynamic_rotate %194 by %c1_i32_263 dim 1 : vector<8x256xf32>, i32 -> vector<8x256xf32>
    %c3_264 = arith.constant 3 : index
    %c0_265 = arith.constant 0 : index
    %c0_266 = arith.constant 0 : index
    %301 = vector.load %arg3[%c3_264, %c0_265, %c0_266] : memref<9x1x256xf32, #tpu.memory_space<vmem>>, vector<1x1x256xf32>
    %302 = vector.shape_cast %301 : vector<1x1x256xf32> to vector<1x256xf32>
    %303 = vector.broadcast %302 : vector<1x256xf32> to vector<8x256xf32>
    %304 = arith.mulf %300, %303 : vector<8x256xf32>
    %c1_267 = arith.constant 1 : index
    %c3_268 = arith.constant 3 : index
    %c0_269 = arith.constant 0 : index
    %c0_270 = arith.constant 0 : index
    %305 = vector.load %arg4[%c1_267, %c3_268, %c0_269, %c0_270] : memref<2x9x8x8xf32, #tpu.memory_space<vmem>>, vector<1x1x8x8xf32>
    %306 = vector.shape_cast %305 : vector<1x1x8x8xf32> to vector<8x8xf32>
    %cst_271 = arith.constant dense<0.000000e+00> : vector<8x256xf32>
    %307 = tpu.matmul %306, %304, %cst_271 {dimension_numbers = #tpu.dot_dimension_numbers<[1], [0], [0], [1], [0, 0, 1, 1], [], []>} : vector<8x8xf32>, vector<8x256xf32>, vector<8x256xf32> -> vector<8x256xf32>
    %308 = arith.addf %299, %307 : vector<8x256xf32>
    %c255_i32_272 = arith.constant 255 : i32
    %309 = tpu.dynamic_rotate %194 by %c255_i32_272 dim 1 : vector<8x256xf32>, i32 -> vector<8x256xf32>
    %c5_273 = arith.constant 5 : index
    %c0_274 = arith.constant 0 : index
    %c0_275 = arith.constant 0 : index
    %310 = vector.load %arg3[%c5_273, %c0_274, %c0_275] : memref<9x1x256xf32, #tpu.memory_space<vmem>>, vector<1x1x256xf32>
    %311 = vector.shape_cast %310 : vector<1x1x256xf32> to vector<1x256xf32>
    %312 = vector.broadcast %311 : vector<1x256xf32> to vector<8x256xf32>
    %313 = arith.mulf %309, %312 : vector<8x256xf32>
    %c1_276 = arith.constant 1 : index
    %c5_277 = arith.constant 5 : index
    %c0_278 = arith.constant 0 : index
    %c0_279 = arith.constant 0 : index
    %314 = vector.load %arg4[%c1_276, %c5_277, %c0_278, %c0_279] : memref<2x9x8x8xf32, #tpu.memory_space<vmem>>, vector<1x1x8x8xf32>
    %315 = vector.shape_cast %314 : vector<1x1x8x8xf32> to vector<8x8xf32>
    %cst_280 = arith.constant dense<0.000000e+00> : vector<8x256xf32>
    %316 = tpu.matmul %315, %313, %cst_280 {dimension_numbers = #tpu.dot_dimension_numbers<[1], [0], [0], [1], [0, 0, 1, 1], [], []>} : vector<8x8xf32>, vector<8x256xf32>, vector<8x256xf32> -> vector<8x256xf32>
    %317 = arith.addf %308, %316 : vector<8x256xf32>
    %c241_i32_281 = arith.constant 241 : i32
    %318 = tpu.dynamic_rotate %194 by %c241_i32_281 dim 1 : vector<8x256xf32>, i32 -> vector<8x256xf32>
    %c6_282 = arith.constant 6 : index
    %c0_283 = arith.constant 0 : index
    %c0_284 = arith.constant 0 : index
    %319 = vector.load %arg3[%c6_282, %c0_283, %c0_284] : memref<9x1x256xf32, #tpu.memory_space<vmem>>, vector<1x1x256xf32>
    %320 = vector.shape_cast %319 : vector<1x1x256xf32> to vector<1x256xf32>
    %321 = vector.broadcast %320 : vector<1x256xf32> to vector<8x256xf32>
    %322 = arith.mulf %318, %321 : vector<8x256xf32>
    %c1_285 = arith.constant 1 : index
    %c6_286 = arith.constant 6 : index
    %c0_287 = arith.constant 0 : index
    %c0_288 = arith.constant 0 : index
    %323 = vector.load %arg4[%c1_285, %c6_286, %c0_287, %c0_288] : memref<2x9x8x8xf32, #tpu.memory_space<vmem>>, vector<1x1x8x8xf32>
    %324 = vector.shape_cast %323 : vector<1x1x8x8xf32> to vector<8x8xf32>
    %cst_289 = arith.constant dense<0.000000e+00> : vector<8x256xf32>
    %325 = tpu.matmul %324, %322, %cst_289 {dimension_numbers = #tpu.dot_dimension_numbers<[1], [0], [0], [1], [0, 0, 1, 1], [], []>} : vector<8x8xf32>, vector<8x256xf32>, vector<8x256xf32> -> vector<8x256xf32>
    %326 = arith.addf %317, %325 : vector<8x256xf32>
    %c240_i32_290 = arith.constant 240 : i32
    %327 = tpu.dynamic_rotate %194 by %c240_i32_290 dim 1 : vector<8x256xf32>, i32 -> vector<8x256xf32>
    %c7_291 = arith.constant 7 : index
    %c0_292 = arith.constant 0 : index
    %c0_293 = arith.constant 0 : index
    %328 = vector.load %arg3[%c7_291, %c0_292, %c0_293] : memref<9x1x256xf32, #tpu.memory_space<vmem>>, vector<1x1x256xf32>
    %329 = vector.shape_cast %328 : vector<1x1x256xf32> to vector<1x256xf32>
    %330 = vector.broadcast %329 : vector<1x256xf32> to vector<8x256xf32>
    %331 = arith.mulf %327, %330 : vector<8x256xf32>
    %c1_294 = arith.constant 1 : index
    %c7_295 = arith.constant 7 : index
    %c0_296 = arith.constant 0 : index
    %c0_297 = arith.constant 0 : index
    %332 = vector.load %arg4[%c1_294, %c7_295, %c0_296, %c0_297] : memref<2x9x8x8xf32, #tpu.memory_space<vmem>>, vector<1x1x8x8xf32>
    %333 = vector.shape_cast %332 : vector<1x1x8x8xf32> to vector<8x8xf32>
    %cst_298 = arith.constant dense<0.000000e+00> : vector<8x256xf32>
    %334 = tpu.matmul %333, %331, %cst_298 {dimension_numbers = #tpu.dot_dimension_numbers<[1], [0], [0], [1], [0, 0, 1, 1], [], []>} : vector<8x8xf32>, vector<8x256xf32>, vector<8x256xf32> -> vector<8x256xf32>
    %335 = arith.addf %326, %334 : vector<8x256xf32>
    %c239_i32_299 = arith.constant 239 : i32
    %336 = tpu.dynamic_rotate %194 by %c239_i32_299 dim 1 : vector<8x256xf32>, i32 -> vector<8x256xf32>
    %c8_300 = arith.constant 8 : index
    %c0_301 = arith.constant 0 : index
    %c0_302 = arith.constant 0 : index
    %337 = vector.load %arg3[%c8_300, %c0_301, %c0_302] : memref<9x1x256xf32, #tpu.memory_space<vmem>>, vector<1x1x256xf32>
    %338 = vector.shape_cast %337 : vector<1x1x256xf32> to vector<1x256xf32>
    %339 = vector.broadcast %338 : vector<1x256xf32> to vector<8x256xf32>
    %340 = arith.mulf %336, %339 : vector<8x256xf32>
    %c1_303 = arith.constant 1 : index
    %c8_304 = arith.constant 8 : index
    %c0_305 = arith.constant 0 : index
    %c0_306 = arith.constant 0 : index
    %341 = vector.load %arg4[%c1_303, %c8_304, %c0_305, %c0_306] : memref<2x9x8x8xf32, #tpu.memory_space<vmem>>, vector<1x1x8x8xf32>
    %342 = vector.shape_cast %341 : vector<1x1x8x8xf32> to vector<8x8xf32>
    %cst_307 = arith.constant dense<0.000000e+00> : vector<8x256xf32>
    %343 = tpu.matmul %342, %340, %cst_307 {dimension_numbers = #tpu.dot_dimension_numbers<[1], [0], [0], [1], [0, 0, 1, 1], [], []>} : vector<8x8xf32>, vector<8x256xf32>, vector<8x256xf32> -> vector<8x256xf32>
    %344 = arith.addf %335, %343 : vector<8x256xf32>
    %c0_308 = arith.constant 0 : index
    %c2_309 = arith.constant 2 : index
    %345 = vector.load %arg5[%c0_308, %c2_309] : memref<8x4xf32, #tpu.memory_space<vmem>>, vector<8x1xf32>
    %c0_310 = arith.constant 0 : index
    %c3_311 = arith.constant 3 : index
    %346 = vector.load %arg5[%c0_310, %c3_311] : memref<8x4xf32, #tpu.memory_space<vmem>>, vector<8x1xf32>
    %347 = arith.mulf %269, %269 : vector<8x256xf32>
    %348 = arith.addf %269, %344 : vector<8x256xf32>
    %349 = arith.mulf %344, %344 : vector<8x256xf32>
    %350 = arith.addf %347, %349 : vector<8x256xf32>
    %cst_312 = arith.constant dense<0.000000e+00> : vector<8xf32>
    %351 = vector.multi_reduction <add>, %348, %cst_312 [1] : vector<8x256xf32> to vector<8xf32>
    %352 = vector.shape_cast %351 : vector<8xf32> to vector<8x1xf32>
    %cst_313 = arith.constant 0.001953125 : f32
    %353 = vector.broadcast %cst_313 : f32 to vector<8x1xf32>
    %354 = arith.mulf %352, %353 : vector<8x1xf32>
    %cst_314 = arith.constant dense<0.000000e+00> : vector<8xf32>
    %355 = vector.multi_reduction <add>, %350, %cst_314 [1] : vector<8x256xf32> to vector<8xf32>
    %356 = vector.shape_cast %355 : vector<8xf32> to vector<8x1xf32>
    %cst_315 = arith.constant 0.001953125 : f32
    %357 = vector.broadcast %cst_315 : f32 to vector<8x1xf32>
    %358 = arith.mulf %356, %357 : vector<8x1xf32>
    %359 = arith.mulf %354, %354 : vector<8x1xf32>
    %360 = arith.subf %358, %359 : vector<8x1xf32>
    %cst_316 = arith.constant 0.000000e+00 : f32
    %361 = vector.broadcast %cst_316 : f32 to vector<8x1xf32>
    %362 = arith.maximumf %360, %361 : vector<8x1xf32>
    %cst_317 = arith.constant 9.99999974E-6 : f32
    %363 = vector.broadcast %cst_317 : f32 to vector<8x1xf32>
    %364 = arith.addf %362, %363 : vector<8x1xf32>
    %365 = math.rsqrt %364 : vector<8x1xf32>
    %366 = vector.broadcast %354 : vector<8x1xf32> to vector<8x256xf32>
    %367 = arith.subf %269, %366 : vector<8x256xf32>
    %368 = vector.broadcast %365 : vector<8x1xf32> to vector<8x256xf32>
    %369 = arith.mulf %367, %368 : vector<8x256xf32>
    %370 = vector.broadcast %345 : vector<8x1xf32> to vector<8x256xf32>
    %371 = arith.mulf %370, %369 : vector<8x256xf32>
    %372 = vector.broadcast %346 : vector<8x1xf32> to vector<8x256xf32>
    %373 = arith.addf %371, %372 : vector<8x256xf32>
    %cst_318 = arith.constant 0.000000e+00 : f32
    %374 = vector.broadcast %cst_318 : f32 to vector<8x256xf32>
    %375 = arith.maximumf %373, %374 : vector<8x256xf32>
    %376 = vector.broadcast %354 : vector<8x1xf32> to vector<8x256xf32>
    %377 = arith.subf %344, %376 : vector<8x256xf32>
    %378 = vector.broadcast %365 : vector<8x1xf32> to vector<8x256xf32>
    %379 = arith.mulf %377, %378 : vector<8x256xf32>
    %380 = vector.broadcast %345 : vector<8x1xf32> to vector<8x256xf32>
    %381 = arith.mulf %380, %379 : vector<8x256xf32>
    %382 = vector.broadcast %346 : vector<8x1xf32> to vector<8x256xf32>
    %383 = arith.addf %381, %382 : vector<8x256xf32>
    %cst_319 = arith.constant 0.000000e+00 : f32
    %384 = vector.broadcast %cst_319 : f32 to vector<8x256xf32>
    %385 = arith.maximumf %383, %384 : vector<8x256xf32>
    %c0_320 = arith.constant 0 : index
    %c0_321 = arith.constant 0 : index
    %c0_322 = arith.constant 0 : index
    %386 = vector.load %arg2[%c0_320, %c0_321, %c0_322] : memref<2x1x256xf32, #tpu.memory_space<vmem>>, vector<1x1x256xf32>
    %387 = vector.shape_cast %386 : vector<1x1x256xf32> to vector<1x256xf32>
    %388 = vector.broadcast %387 : vector<1x256xf32> to vector<8x256xf32>
    %389 = arith.mulf %375, %388 : vector<8x256xf32>
    %390 = arith.addf %1, %389 : vector<8x256xf32>
    %c0_323 = arith.constant 0 : index
    %c0_324 = arith.constant 0 : index
    %c0_325 = arith.constant 0 : index
    %391 = vector.load %arg6[%c0_323, %c0_324, %c0_325] : memref<2x8x256xf32, #tpu.memory_space<vmem>>, vector<1x8x256xf32>
    %392 = vector.shape_cast %391 : vector<1x8x256xf32> to vector<8x256xf32>
    %393 = vector.shape_cast %390 : vector<8x256xf32> to vector<1x8x256xf32>
    tpu.vector_store %arg6[%c0_323, %c0_324, %c0_325], %393 {strides = array<i32>} : memref<2x8x256xf32, #tpu.memory_space<vmem>>, vector<1x8x256xf32>,
    %c1_326 = arith.constant 1 : index
    %c0_327 = arith.constant 0 : index
    %c0_328 = arith.constant 0 : index
    %394 = vector.load %arg2[%c1_326, %c0_327, %c0_328] : memref<2x1x256xf32, #tpu.memory_space<vmem>>, vector<1x1x256xf32>
    %395 = vector.shape_cast %394 : vector<1x1x256xf32> to vector<1x256xf32>
    %396 = vector.broadcast %395 : vector<1x256xf32> to vector<8x256xf32>
    %397 = arith.mulf %385, %396 : vector<8x256xf32>
    %398 = arith.addf %3, %397 : vector<8x256xf32>
    %c1_329 = arith.constant 1 : index
    %c0_330 = arith.constant 0 : index
    %c0_331 = arith.constant 0 : index
    %399 = vector.load %arg6[%c1_329, %c0_330, %c0_331] : memref<2x8x256xf32, #tpu.memory_space<vmem>>, vector<1x8x256xf32>
    %400 = vector.shape_cast %399 : vector<1x8x256xf32> to vector<8x256xf32>
    %401 = vector.shape_cast %398 : vector<8x256xf32> to vector<1x8x256xf32>
    tpu.vector_store %arg6[%c1_329, %c0_330, %c0_331], %401 {strides = array<i32>} : memref<2x8x256xf32, #tpu.memory_space<vmem>>, vector<1x8x256xf32>,
    return
  }
  func.func @transform_0(%arg0: i32) -> (i32, i32, i32) {
    %c0_i32 = arith.constant 0 : i32
    %c0_i32_0 = arith.constant 0 : i32
    %c0_i32_1 = arith.constant 0 : i32
    %c0_i32_2 = arith.constant 0 : i32
    return %c0_i32, %c0_i32_0, %c0_i32_1 : i32, i32, i32
  }
  func.func @transform_1(%arg0: i32) -> (i32, i32, i32) {
    %c0_i32 = arith.constant 0 : i32
    %c0_i32_0 = arith.constant 0 : i32
    %c0_i32_1 = arith.constant 0 : i32
    %c0_i32_2 = arith.constant 0 : i32
    return %c0_i32, %c0_i32_0, %c0_i32_1 : i32, i32, i32
  }
  func.func @transform_2(%arg0: i32) -> (i32, i32, i32) {
    %c0_i32 = arith.constant 0 : i32
    %c0_i32_0 = arith.constant 0 : i32
    %c0_i32_1 = arith.constant 0 : i32
    %c0_i32_2 = arith.constant 0 : i32
    return %c0_i32, %c0_i32_0, %c0_i32_1 : i32, i32, i32
  }
  func.func @transform_3(%arg0: i32) -> (i32, i32, i32, i32) {
    %c0_i32 = arith.constant 0 : i32
    %c0_i32_0 = arith.constant 0 : i32
    %c0_i32_1 = arith.constant 0 : i32
    %c0_i32_2 = arith.constant 0 : i32
    %c0_i32_3 = arith.constant 0 : i32
    return %c0_i32, %c0_i32_0, %c0_i32_1, %c0_i32_2 : i32, i32, i32, i32
  }
  func.func @transform_4(%arg0: i32) -> (i32, i32) {
    %c0_i32 = arith.constant 0 : i32
    %c0_i32_0 = arith.constant 0 : i32
    %c0_i32_1 = arith.constant 0 : i32
    return %c0_i32, %c0_i32_0 : i32, i32
  }
  func.func @transform_5(%arg0: i32) -> (i32, i32, i32) {
    %c0_i32 = arith.constant 0 : i32
    %c0_i32_0 = arith.constant 0 : i32
    %c0_i32_1 = arith.constant 0 : i32
    %c0_i32_2 = arith.constant 0 : i32
    return %c0_i32, %c0_i32_0, %c0_i32_1 : i32, i32, i32
  }
}

</mosaic_0001>

<bundles_post_ra>
// kernel: tpu_custom_call.1
= control target key start
LH: loop header
LB: loop body
LE: loop exit
PB: predicated region body
PF: predicated region fallthrough
CT: control target
= control target key end

     0   :  { %s2938_s0 = inlined_call_operand.vmem [shape: f32[2,8,256], index: 0, kind: input, shape index: {}]   ;;  %s2939_s1 = inlined_call_operand.vmem [shape: f32[2,1,256], index: 1, kind: input, shape index: {}]   ;;  %s2940_s2 = inlined_call_operand.vmem [shape: f32[9,1,256], index: 2, kind: input, shape index: {}]   ;;  %s2941_s3 = inlined_call_operand.vmem [shape: f32[2,9,8,8], index: 3, kind: input, shape index: {}]   ;;  %s2942_s4 = inlined_call_operand.vmem [shape: f32[8,4], index: 4, kind: input, shape index: {}]   ;;  %s2943_s5 = inlined_call_operand.hbm [shape: f32[2,8,256], index: 5, kind: output, shape index: {}]  }
   0x1   :  { %v21_v0 = vld [vmem:[%s2938_s0] sm:$0xff] }
   0x2   :  { %10 = vsyncpa [#allocation3], 0  ;;  %s2247_s20 = smov 15   ;;  %s2248_s21 = smov 17   ;;  %v22_v1 = vld [vmem:[%s2938_s0 + $0x8] sm:$0xff]  ;;  %108 = vmatpush.msra.mxu2 %v21_v0  ;;  %v2314_v2 = vld [vmem:[%s2938_s0 + $0x10] sm:$0xff]  ;;  %v32_v7 = vlaneseq }
   0x3   :  { %196 = vrot.lane.b32.xlu1 %v21_v0, %s2247_s20  ;;  %28 = vrot.lane.b32.xlu0 %v21_v0, %s2248_s21  ;;  %s2249_s24 = smov 16   ;;  %s2250_s25 = smov 127   ;;  %v2321_v3 = vld [vmem:[%s2938_s0 + $0x18] sm:$0xff]  ;;  %v2358_v4 = vld [vmem:[%s2941_s3 + $0x20] sm:$0xff]  ;;  %vm46_vm0 = vcmask 64512  }
   0x4   :  { %133 = vrot.lane.b32.xlu2 %v21_v0, %s2249_s24  ;;  %128 = vmatpush.msra.mxu3 %v22_v1  ;;  %s2251_s26 = smov 1   ;;  %s2252_s27 = smov 112   ;;  %v2366_v11 = vand.u32 127, %v32_v7  ;;  %v37_v12 = vld [vmem:[%s2940_s2] sm:$0x3]  ;;  %v2421_v38 = vld [vmem:[%s2941_s3 + $0x10] sm:$0xff] }
   0x5   :  { %s2253_s28 = smov 113   ;;  %s2254_s8 = smov 111   ;;  %2100 = vmatmul.msk.f32.vlgmr.msra.gmra.mxu2 %vm46_vm0, %v2358_v4  ;;  %2101 = vmatmul.msk.f32.vlgmr.msra.gmra.mxu3 %vm46_vm0, %v2358_v4  ;;  %v2106_v13 = vld [vmem:[%s2940_s2 + $0x4] sm:$0x3]  ;;  %v2102_v14 = vld [vmem:[%s2940_s2 + $0x2] sm:$0x3] }
   0x6   :  { %vm137_vm1 = vcmp.lt.s32.totalorder %v2366_v11, 16  ;;  %vm200_vm2 = vcmp.lt.s32.totalorder %v2366_v11, 15  ;;  %vm34_vm3 = vcmp.lt.s32.totalorder %v2366_v11, 17  ;;  %v2380_v15 = vperm.slane %v37_v12, 0  ;;  %v2411_v34 = vld [vmem:[%s2941_s3] sm:$0xff]  ;;  %v2448_v48 = vld [vmem:[%s2941_s3 + $0x8] sm:$0xff] }
   0x7   :  { %v2382_v16 = vperm.slane %v37_v12, 1  ;;  %v2384_v17 = vperm.slane %v2106_v13, 0  ;;  %v2386_v18 = vperm.slane %v2106_v13, 1  ;;  %v2392_v23 = vperm.slane %v2102_v14, 0  ;;  %v2114_v35 = vld [vmem:[%s2940_s2 + $0xa] sm:$0x3] }
   0x8   :  { %v2394_v24 = vperm.slane %v2102_v14, 1  ;;  %vm326_vm4 = vcmp.lt.s32.totalorder %v2366_v11, 127  ;;  %v2428_v39 = vperm.slane %v2114_v35, 0  ;;  %v2430_v40 = vperm.slane %v2114_v35, 1  ;;  %v2122_v47 = vld [vmem:[%s2940_s2 + $0xe] sm:$0x3] }
   0x9   :  { %v2110_v49 = vld [vmem:[%s2940_s2 + $0x6] sm:$0x3]  ;;  %vm452_vm5 = vcmp.lt.s32.totalorder %v2366_v11, 112  ;;  %v2454_v51 = vperm.slane %v2122_v47, 0  ;;  %v2459_v52 = vld [vmem:[%s2941_s3 + $0x28] sm:$0xff]  ;;  %v2465_v53 = vperm.slane %v2122_v47, 1 }
   0xa   :  { %vm263_vm6 = vcmp.lt.s32.totalorder %v2366_v11, 1  ;;  %v2468_v54 = vperm.slane %v2110_v49, 0  ;;  %v2470_v55 = vperm.slane %v2110_v49, 1  ;;  %v2501_v7 = vld [vmem:[%s2941_s3 + $0x38] sm:$0xff]  ;;  %vm389_vm7 = vcmp.lt.s32.totalorder %v2366_v11, 113 }
   0xb   :  { %198 = vrot.lane.b32.xlu1 %v22_v1, %s2247_s20  ;;  %30 = vrot.lane.b32.xlu0 %v22_v1, %s2248_s21  ;;  %vm515_vm8 = vcmp.lt.s32.totalorder %v2366_v11, 111 }
   0xc   :  { %135 = vrot.lane.b32.xlu2 %v22_v1, %s2249_s24 }
  0x13   :  { %324 = vrot.lane.b32.xlu1 %v22_v1, %s2250_s25  ;;  %322 = vrot.lane.b32.xlu0 %v21_v0, %s2250_s25 }
  0x14   :  { %259 = vrot.lane.b32.xlu2 %v21_v0, %s2251_s26 }
  0x1b   :  { %448 = vrot.lane.b32.xlu1 %v21_v0, %s2252_s27  ;;  %261 = vrot.lane.b32.xlu0 %v22_v1, %s2251_s26 }
  0x1c   :  { %450 = vrot.lane.b32.xlu2 %v22_v1, %s2252_s27 }
  0x23   :  { %387 = vrot.lane.b32.xlu1 %v22_v1, %s2253_s28  ;;  %385 = vrot.lane.b32.xlu0 %v21_v0, %s2253_s28 }
  0x24   :  { %574 = vrot.lane.b32.xlu2 %v2314_v2, %s2248_s21 }
  0x2b   :  { %511 = vrot.lane.b32.xlu1 %v21_v0, %s2254_s8  ;;  %576 = vrot.lane.b32.xlu0 %v2321_v3, %s2248_s21 }
  0x2c   :  { %513 = vrot.lane.b32.xlu2 %v22_v1, %s2254_s8 }
  0x33   :  { %664 = vrot.lane.b32.xlu1 %v2321_v3, %s2249_s24  ;;  %662 = vrot.lane.b32.xlu0 %v2314_v2, %s2249_s24 }
  0x34   :  { %762 = vrot.lane.b32.xlu2 %v2314_v2, %s2251_s26 }
  0x3b   :  { %712 = vrot.lane.b32.xlu1 %v2314_v2, %s2247_s20  ;;  %764 = vrot.lane.b32.xlu0 %v2321_v3, %s2251_s26 }
  0x3c   :  { %714 = vrot.lane.b32.xlu2 %v2321_v3, %s2247_s20 }
  0x43   :  { %864 = vrot.lane.b32.xlu1 %v2321_v3, %s2253_s28  ;;  %862 = vrot.lane.b32.xlu0 %v2314_v2, %s2253_s28 }
  0x44   :  { %812 = vrot.lane.b32.xlu2 %v2314_v2, %s2250_s25 }
  0x4b   :  { %962 = vrot.lane.b32.xlu1 %v2314_v2, %s2254_s8  ;;  %814 = vrot.lane.b32.xlu0 %v2321_v3, %s2250_s25 }
  0x4c   :  { %964 = vrot.lane.b32.xlu2 %v2321_v3, %s2254_s8 }
  0x53   :  { %914 = vrot.lane.b32.xlu1 %v2321_v3, %s2252_s27  ;;  %912 = vrot.lane.b32.xlu0 %v2314_v2, %s2252_s27 }
  0x5e   :  { %v134_v5 = vpop.permute.xlu2 %133 }
  0x66   :  { %v136_v6 = vpop.permute.xlu2 %135 }
  0x67   :  { %v138_v19 = vsel %vm137_vm1, %v134_v5, %v136_v6  ;;  %v139_v20 = vsel %vm137_vm1, %v136_v6, %v134_v5  ;;  %v2493_v5 = vld [vmem:[%s2941_s3 + $0x18] sm:$0xff]  ;;  %v2118_v6 = vld [vmem:[%s2940_s2 + $0xc] sm:$0x3] }
  0x68   :  { %v147_v36 = vmul.f32 %v2392_v23, %v139_v20  ;;  %v148_v37 = vmul.f32 %v2394_v24, %v138_v19 }
  0x6e   :  { %v2364_v8 = vpop.permute.xlu2 %259 }
  0x75   :  { %v197_v9 = vpop.permute.xlu1 %196  ;;  %v29_v10 = vpop.permute.xlu0 %28 }
  0x76   :  { %v451_v29 = vpop.permute.xlu2 %450 }
  0x7d   :  { %v199_v21 = vpop.permute.xlu1 %198  ;;  %v31_v22 = vpop.permute.xlu0 %30 }
  0x7e   :  { %v201_v25 = vsel %vm200_vm2, %v197_v9, %v199_v21  ;;  %v202_v26 = vsel %vm200_vm2, %v199_v21, %v197_v9  ;;  %v36_v27 = vsel %vm34_vm3, %v31_v22, %v29_v10  ;;  %v35_v28 = vsel %vm34_vm3, %v29_v10, %v31_v22  ;;  %v575_v50 = vpop.permute.xlu2 %574  ;;  %v2525_v22 = vld [vmem:[%s2941_s3 + $0x30] sm:$0xff] }
  0x7f   :  { %v43_v30 = vmul.f32 %v2380_v15, %v36_v27  ;;  %v44_v31 = vmul.f32 %v2382_v16, %v35_v28  ;;  %v210_v32 = vmul.f32 %v2384_v17, %v202_v26  ;;  %v211_v33 = vmul.f32 %v2386_v18, %v201_v25  ;;  %v2126_v25 = vld [vmem:[%s2940_s2 + $0x10] sm:$0x3] }
  0x80   :  { %v2508_v9 = vperm.slane %v2118_v6, 0  ;;  %v2510_v10 = vperm.slane %v2118_v6, 1  ;;  %v2535_v26 = vperm.slane %v2126_v25, 0  ;;  %v2537_v27 = vperm.slane %v2126_v25, 1 }
  0x81   :  { %65 = vmatpush.msra.mxu0 %v43_v30  ;;  %85 = vmatpush.msra.mxu1 %v44_v31 }
  0x82   :  { %232 = vmatpush.msrb.mxu2 %v210_v32  ;;  %252 = vmatpush.msrb.mxu3 %v211_v33 }
  0x83   :  { %2098 = vmatmul.msk.f32.vlgmr.msra.gmra.mxu0 %vm46_vm0, %v2411_v34  ;;  %2099 = vmatmul.msk.f32.vlgmr.msra.gmra.mxu1 %vm46_vm0, %v2411_v34 }
  0x84   :  { %169 = vmatpush.msrb.mxu0 %v147_v36  ;;  %189 = vmatpush.msrb.mxu1 %v148_v37 }
  0x85   :  { %v325_v41 = vpop.permute.xlu1 %324  ;;  %v323_v42 = vpop.permute.xlu0 %322  ;;  %2108 = vmatmul.msk.f32.vlgmr.msrb.gmra.mxu2 %vm46_vm0, %v2421_v38  ;;  %2109 = vmatmul.msk.f32.vlgmr.msrb.gmra.mxu3 %vm46_vm0, %v2421_v38 }
  0x86   :  { %v327_v43 = vsel %vm326_vm4, %v323_v42, %v325_v41  ;;  %v328_v44 = vsel %vm326_vm4, %v325_v41, %v323_v42 }
  0x87   :  { %v336_v45 = vmul.f32 %v2428_v39, %v327_v43  ;;  %v337_v46 = vmul.f32 %v2430_v40, %v328_v44  ;;  %v2554_v43 = vld [vmem:[%s2941_s3 + $0x40] sm:$0xff] }
  0x89   :  { %358 = vmatpush.msra.mxu2 %v336_v45  ;;  %378 = vmatpush.msra.mxu3 %v337_v46 }
  0x8b   :  { %2104 = vmatmul.msk.f32.vlgmr.msrb.gmra.mxu0 %vm46_vm0, %v2448_v48  ;;  %2105 = vmatmul.msk.f32.vlgmr.msrb.gmra.mxu1 %vm46_vm0, %v2448_v48 }
  0x8d   :  { %v449_v56 = vpop.permute.xlu1 %448  ;;  %v262_v57 = vpop.permute.xlu0 %261  ;;  %2116 = vmatmul.msk.f32.vlgmr.msra.gmra.mxu2 %vm46_vm0, %v2459_v52  ;;  %2117 = vmatmul.msk.f32.vlgmr.msra.gmra.mxu3 %vm46_vm0, %v2459_v52 }
  0x8e   :  { %v453_v58 = vsel %vm452_vm5, %v449_v56, %v451_v29  ;;  %v454_v59 = vsel %vm452_vm5, %v451_v29, %v449_v56  ;;  %v264_v60 = vsel %vm263_vm6, %v2364_v8, %v262_v57  ;;  %v265_v61 = vsel %vm263_vm6, %v262_v57, %v2364_v8  ;;  %v514_v8 = vpop.permute.xlu2 %513 }
  0x8f   :  { %v462_v62 = vmul.f32 %v2454_v51, %v453_v58  ;;  %v463_v63 = vmul.f32 %v2465_v53, %v454_v59  ;;  %v273_v0 = vmul.f32 %v2468_v54, %v265_v61  ;;  %v274_v1 = vmul.f32 %v2470_v55, %v264_v60 }
  0x91   :  { %295 = vmatpush.msra.mxu0 %v273_v0  ;;  %315 = vmatpush.msra.mxu1 %v274_v1 }
  0x92   :  { %484 = vmatpush.msrb.mxu2 %v462_v62  ;;  %504 = vmatpush.msrb.mxu3 %v463_v63 }
  0x93   :  { %2112 = vmatmul.msk.f32.vlgmr.msra.gmra.mxu0 %vm46_vm0, %v2493_v5  ;;  %2113 = vmatmul.msk.f32.vlgmr.msra.gmra.mxu1 %vm46_vm0, %v2493_v5 }
  0x95   :  { %v388_v12 = vpop.permute.xlu1 %387  ;;  %v386_v13 = vpop.permute.xlu0 %385  ;;  %2124 = vmatmul.msk.f32.vlgmr.msrb.gmra.mxu2 %vm46_vm0, %v2501_v7  ;;  %2125 = vmatmul.msk.f32.vlgmr.msrb.gmra.mxu3 %vm46_vm0, %v2501_v7 }
  0x96   :  { %v390_v14 = vsel %vm389_vm7, %v386_v13, %v388_v12  ;;  %v391_v19 = vsel %vm389_vm7, %v388_v12, %v386_v13  ;;  %v763_v28 = vpop.permute.xlu2 %762 }
  0x97   :  { %v399_v20 = vmul.f32 %v2508_v9, %v390_v14  ;;  %v400_v21 = vmul.f32 %v2510_v10, %v391_v19 }
  0x99   :  { %421 = vmatpush.msrb.mxu0 %v399_v20  ;;  %441 = vmatpush.msrb.mxu1 %v400_v21 }
  0x9b   :  { %2120 = vmatmul.msk.f32.vlgmr.msrb.gmra.mxu0 %vm46_vm0, %v2525_v22  ;;  %2121 = vmatmul.msk.f32.vlgmr.msrb.gmra.mxu1 %vm46_vm0, %v2525_v22 }
  0x9d   :  { %v512_v29 = vpop.permute.xlu1 %511  ;;  %v577_v30 = vpop.permute.xlu0 %576 }
  0x9e   :  { %v516_v31 = vsel %vm515_vm8, %v512_v29, %v514_v8  ;;  %v517_v32 = vsel %vm515_vm8, %v514_v8, %v512_v29  ;;  %v578_v33 = vsel %vm34_vm3, %v575_v50, %v577_v30  ;;  %v579_v35 = vsel %vm34_vm3, %v577_v30, %v575_v50  ;;  %v715_v56 = vpop.permute.xlu2 %714 }
  0x9f   :  { %v525_v36 = vmul.f32 %v2535_v26, %v516_v31  ;;  %v526_v37 = vmul.f32 %v2537_v27, %v517_v32  ;;  %v580_v41 = vmul.f32 %v579_v35, %v2380_v15  ;;  %v581_v42 = vmul.f32 %v578_v33, %v2382_v16 }
  0xa1   :  { %547 = vmatpush.msra.mxu0 %v525_v36  ;;  %567 = vmatpush.msra.mxu1 %v526_v37 }
  0xa2   :  { %597 = vmatpush.msra.mxu2 %v580_v41  ;;  %617 = vmatpush.msra.mxu3 %v581_v42  ;;  %v110_v41 = vpop.f32.mrf.mxu2  ;;  %v130_v42 = vpop.f32.mrf.mxu3 }
  0xa3   :  { %2128 = vmatmul.msk.f32.vlgmr.msra.gmra.mxu0 %vm46_vm0, %v2554_v43  ;;  %2129 = vmatmul.msk.f32.vlgmr.msra.gmra.mxu1 %vm46_vm0, %v2554_v43 }
  0xa4   :  { %2130 = vmatmul.msk.f32.vlgmr.msra.gmra.mxu2 %vm46_vm0, %v2411_v34  ;;  %2131 = vmatmul.msk.f32.vlgmr.msra.gmra.mxu3 %vm46_vm0, %v2411_v34 }
  0xa5   :  { %v665_v44 = vpop.permute.xlu1 %664  ;;  %v663_v45 = vpop.permute.xlu0 %662  ;;  %637 = vmatpush.msrb.mxu0 %v2314_v2  ;;  %657 = vmatpush.msrb.mxu1 %v2321_v3 }
  0xa6   :  { %v666_v46 = vsel %vm137_vm1, %v663_v45, %v665_v44  ;;  %v667_v47 = vsel %vm137_vm1, %v665_v44, %v663_v45  ;;  %v813_v62 = vpop.permute.xlu2 %812 }
  0xa7   :  { %v668_v49 = vmul.f32 %v667_v47, %v2392_v23  ;;  %v669_v50 = vmul.f32 %v666_v46, %v2394_v24 }
  0xa9   :  { %685 = vmatpush.msrb.mxu2 %v668_v49  ;;  %705 = vmatpush.msrb.mxu3 %v669_v50 }
  0xab   :  { %2132 = vmatmul.msk.f32.vlgmr.msrb.gmra.mxu0 %vm46_vm0, %v2358_v4  ;;  %2133 = vmatmul.msk.f32.vlgmr.msrb.gmra.mxu1 %vm46_vm0, %v2358_v4 }
  0xac   :  { %2134 = vmatmul.msk.f32.vlgmr.msrb.gmra.mxu2 %vm46_vm0, %v2448_v48  ;;  %2135 = vmatmul.msk.f32.vlgmr.msrb.gmra.mxu3 %vm46_vm0, %v2448_v48 }
  0xad   :  { %v713_v2 = vpop.permute.xlu1 %712  ;;  %v765_v3 = vpop.permute.xlu0 %764 }
  0xae   :  { %v716_v34 = vsel %vm200_vm2, %v713_v2, %v715_v56  ;;  %v717_v57 = vsel %vm200_vm2, %v715_v56, %v713_v2  ;;  %v766_v58 = vsel %vm263_vm6, %v763_v28, %v765_v3  ;;  %v767_v4 = vsel %vm263_vm6, %v765_v3, %v763_v28 }
  0xaf   :  { %v718_v59 = vmul.f32 %v717_v57, %v2384_v17  ;;  %v719_v60 = vmul.f32 %v716_v34, %v2386_v18  ;;  %v768_v48 = vmul.f32 %v767_v4, %v2468_v54  ;;  %v769_v61 = vmul.f32 %v766_v58, %v2470_v55 }
  0xb1   :  { %735 = vmatpush.msra.mxu0 %v718_v59  ;;  %755 = vmatpush.msra.mxu1 %v719_v60 }
  0xb2   :  { %785 = vmatpush.msra.mxu2 %v768_v48  ;;  %805 = vmatpush.msra.mxu3 %v769_v61 }
  0xb3   :  { %2136 = vmatmul.msk.f32.vlgmr.msra.gmra.mxu0 %vm46_vm0, %v2421_v38  ;;  %2137 = vmatmul.msk.f32.vlgmr.msra.gmra.mxu1 %vm46_vm0, %v2421_v38  ;;  %v965_v38 = vpop.permute.xlu2 %964 }
  0xb4   :  { %2138 = vmatmul.msk.f32.vlgmr.msra.gmra.mxu2 %vm46_vm0, %v2493_v5  ;;  %2139 = vmatmul.msk.f32.vlgmr.msra.gmra.mxu3 %vm46_vm0, %v2493_v5 }
  0xb5   :  { %v865_v63 = vpop.permute.xlu1 %864  ;;  %v863_v0 = vpop.permute.xlu0 %862 }
  0xb6   :  { %v866_v1 = vsel %vm389_vm7, %v863_v0, %v865_v63  ;;  %v867_v6 = vsel %vm389_vm7, %v865_v63, %v863_v0 }
  0xb7   :  { %v868_v8 = vmul.f32 %v866_v1, %v2508_v9  ;;  %v869_v12 = vmul.f32 %v867_v6, %v2510_v10  ;;  %v2643_v1 = vld [vmem:[%s2942_s4] sm:$0xff]  ;;  %v2255_v6 = vmov 0  }
  0xb8   :  { %2208 = vset.pattern.permute.xlu1 %v2255_v6 }
  0xb9   :  { %885 = vmatpush.msrb.mxu2 %v868_v8  ;;  %905 = vmatpush.msrb.mxu3 %v869_v12 }
  0xba   :  { %1049 = vperm.xlu1 %2208, %v2643_v1  }
  0xbc   :  { %2142 = vmatmul.msk.f32.vlgmr.msrb.gmra.mxu2 %vm46_vm0, %v2525_v22  ;;  %2143 = vmatmul.msk.f32.vlgmr.msrb.gmra.mxu3 %vm46_vm0, %v2525_v22 }
  0xbd   :  { %v963_v5 = vpop.permute.xlu1 %962  ;;  %v815_v13 = vpop.permute.xlu0 %814 }
  0xbe   :  { %v966_v14 = vsel %vm515_vm8, %v963_v5, %v965_v38  ;;  %v967_v19 = vsel %vm515_vm8, %v965_v38, %v963_v5  ;;  %v816_v20 = vsel %vm326_vm4, %v813_v62, %v815_v13  ;;  %v817_v21 = vsel %vm326_vm4, %v815_v13, %v813_v62 }
  0xbf   :  { %v968_v25 = vmul.f32 %v966_v14, %v2535_v26  ;;  %v969_v28 = vmul.f32 %v967_v19, %v2537_v27  ;;  %v818_v22 = vmul.f32 %v816_v20, %v2428_v39  ;;  %v819_v29 = vmul.f32 %v817_v21, %v2430_v40 }
  0xc1   :  { %835 = vmatpush.msrb.mxu0 %v818_v22  ;;  %855 = vmatpush.msrb.mxu1 %v819_v29 }
  0xc2   :  { %985 = vmatpush.msra.mxu2 %v968_v25  ;;  %1005 = vmatpush.msra.mxu3 %v969_v28 }
  0xc3   :  { %2140 = vmatmul.msk.f32.vlgmr.msrb.gmra.mxu0 %vm46_vm0, %v2459_v52  ;;  %2141 = vmatmul.msk.f32.vlgmr.msrb.gmra.mxu1 %vm46_vm0, %v2459_v52 }
  0xc4   :  { %2146 = vmatmul.msk.f32.vlgmr.msra.gmra.mxu2 %vm46_vm0, %v2554_v43  ;;  %2147 = vmatmul.msk.f32.vlgmr.msra.gmra.mxu3 %vm46_vm0, %v2554_v43 }
  0xc5   :  { %v915_v30 = vpop.permute.xlu1 %914  ;;  %v913_v31 = vpop.permute.xlu0 %912 }
  0xc6   :  { %v916_v32 = vsel %vm452_vm5, %v913_v31, %v915_v30  ;;  %v917_v33 = vsel %vm452_vm5, %v915_v30, %v913_v31  ;;  %v2256_v31 = vmov 1  }
  0xc7   :  { %v918_v35 = vmul.f32 %v916_v32, %v2454_v51  ;;  %v919_v36 = vmul.f32 %v917_v33, %v2465_v53  ;;  %2209 = vset.pattern.permute.xlu1 %v2256_v31 }
  0xc8   :  { %1055 = vperm.xlu1 %2209, %v2643_v1  }
  0xc9   :  { %935 = vmatpush.msra.mxu0 %v918_v35  ;;  %955 = vmatpush.msra.mxu1 %v919_v36 }
  0xcb   :  { %2144 = vmatmul.msk.f32.vlgmr.msra.gmra.mxu0 %vm46_vm0, %v2501_v7  ;;  %2145 = vmatmul.msk.f32.vlgmr.msra.gmra.mxu1 %vm46_vm0, %v2501_v7 }
 0x100   :  { %v67_v52 = vpop.f32.mrf.mxu0  ;;  %v87_v37 = vpop.f32.mrf.mxu1 }
 0x101   :  { %v111_v63 = vadd.f32 %v110_v41, %v67_v52  ;;  %v131_v0 = vadd.f32 %v130_v42, %v87_v37 }
 0x108   :  { %v171_v43 = vpop.f32.mrf.mxu0  ;;  %v191_v44 = vpop.f32.mrf.mxu1 }
 0x109   :  { %v234_v45 = vpop.f32.mrf.mxu2  ;;  %v254_v46 = vpop.f32.mrf.mxu3  ;;  %v194_v8 = vadd.f32 %v171_v43, %v111_v63  ;;  %v195_v12 = vadd.f32 %v191_v44, %v131_v0 }
 0x10b   :  { %v257_v21 = vadd.f32 %v234_v45, %v194_v8  ;;  %v258_v25 = vadd.f32 %v254_v46, %v195_v12 }
 0x110   :  { %v297_v47 = vpop.f32.mrf.mxu0  ;;  %v317_v49 = vpop.f32.mrf.mxu1 }
 0x111   :  { %v360_v50 = vpop.f32.mrf.mxu2  ;;  %v380_v56 = vpop.f32.mrf.mxu3  ;;  %v320_v29 = vadd.f32 %v297_v47, %v257_v21  ;;  %v321_v30 = vadd.f32 %v317_v49, %v258_v25 }
 0x113   :  { %v383_v52 = vadd.f32 %v360_v50, %v320_v29  ;;  %v384_v37 = vadd.f32 %v380_v56, %v321_v30 }
 0x118   :  { %v423_v2 = vpop.f32.mrf.mxu0  ;;  %v443_v3 = vpop.f32.mrf.mxu1 }
 0x119   :  { %v486_v34 = vpop.f32.mrf.mxu2  ;;  %v506_v57 = vpop.f32.mrf.mxu3  ;;  %v446_v45 = vadd.f32 %v423_v2, %v383_v52  ;;  %v447_v46 = vadd.f32 %v443_v3, %v384_v37 }
 0x11b   :  { %v509_v47 = vadd.f32 %v486_v34, %v446_v45  ;;  %v510_v49 = vadd.f32 %v506_v57, %v447_v46 }
 0x120   :  { %v549_v58 = vpop.f32.mrf.mxu0  ;;  %v569_v4 = vpop.f32.mrf.mxu1 }
 0x121   :  { %v572_v63 = vadd.f32 %v549_v58, %v509_v47  ;;  %v573_v0 = vadd.f32 %v569_v4, %v510_v49 }
 0x127   :  { %v599_v59 = vpop.f32.mrf.mxu2  ;;  %v619_v7 = vpop.f32.mrf.mxu3 }
 0x128   :  { %v639_v60 = vpop.f32.mrf.mxu0  ;;  %v659_v48 = vpop.f32.mrf.mxu1 }
 0x129   :  { %v640_v19 = vadd.f32 %v639_v60, %v599_v59  ;;  %v660_v20 = vadd.f32 %v659_v48, %v619_v7 }
 0x12f   :  { %v687_v61 = vpop.f32.mrf.mxu2  ;;  %v707_v62 = vpop.f32.mrf.mxu3 }
 0x130   :  { %v737_v13 = vpop.f32.mrf.mxu0  ;;  %v757_v14 = vpop.f32.mrf.mxu1  ;;  %v710_v28 = vadd.f32 %v687_v61, %v640_v19  ;;  %v711_v22 = vadd.f32 %v707_v62, %v660_v20 }
 0x132   :  { %v760_v32 = vadd.f32 %v737_v13, %v710_v28  ;;  %v761_v33 = vadd.f32 %v757_v14, %v711_v22 }
 0x137   :  { %v787_v38 = vpop.f32.mrf.mxu2  ;;  %v807_v5 = vpop.f32.mrf.mxu3 }
 0x138   :  { %v810_v43 = vadd.f32 %v787_v38, %v760_v32  ;;  %v811_v44 = vadd.f32 %v807_v5, %v761_v33  ;;  %v1013_v38 = vmul.f32 %v572_v63, %v572_v63  ;;  %v1014_v5 = vmul.f32 %v573_v0, %v573_v0 }
 0x13f   :  { %v887_v35 = vpop.f32.mrf.mxu2  ;;  %v907_v36 = vpop.f32.mrf.mxu3 }
 0x140   :  { %v837_v41 = vpop.f32.mrf.mxu0  ;;  %v857_v42 = vpop.f32.mrf.mxu1 }
 0x141   :  { %v860_v59 = vadd.f32 %v837_v41, %v810_v43  ;;  %v861_v7 = vadd.f32 %v857_v42, %v811_v44 }
 0x143   :  { %v910_v60 = vadd.f32 %v887_v35, %v860_v59  ;;  %v911_v48 = vadd.f32 %v907_v36, %v861_v7  ;;  %v1050_v36 = vpop.permute.xlu1 %1049 }
 0x147   :  { %v987_v61 = vpop.f32.mrf.mxu2  ;;  %v1007_v62 = vpop.f32.mrf.mxu3 }
 0x148   :  { %v937_v6 = vpop.f32.mrf.mxu0  ;;  %v957_v8 = vpop.f32.mrf.mxu1 }
 0x149   :  { %v960_v50 = vadd.f32 %v937_v6, %v910_v60  ;;  %v961_v56 = vadd.f32 %v957_v8, %v911_v48 }
 0x14b   :  { %v1010_v12 = vadd.f32 %v987_v61, %v960_v50  ;;  %v1011_v13 = vadd.f32 %v1007_v62, %v961_v56  ;;  %v1056_v59 = vpop.permute.xlu1 %1055 }
 0x14d   :  { %v1017_v2 = vmul.f32 %v1010_v12, %v1010_v12  ;;  %v1018_v3 = vmul.f32 %v1011_v13, %v1011_v13  ;;  %v1015_v14 = vadd.f32 %v1010_v12, %v572_v63  ;;  %v1016_v19 = vadd.f32 %v1011_v13, %v573_v0 }
 0x14f   :  { %v1021_v34 = vadd.f32 %v1016_v19, %v1015_v14  ;;  %v1019_v57 = vadd.f32 %v1017_v2, %v1013_v38  ;;  %v1020_v20 = vadd.f32 %v1018_v3, %v1014_v5  ;;  %v2702_v5 = vld [vmem:[%s2941_s3 + $0x68] sm:$0xff] }
 0x151   :  { %1022 = vadd.xlane.f32.xlu2 %v1021_v34  ;;  %v1025_v21 = vadd.f32 %v1020_v20, %v1019_v57 }
 0x153   :  { %1026 = vadd.xlane.f32.xlu0 %v1025_v21 }
 0x1c4   :  { %v1023_v58 = vpop.xlane.xlu2 %1022 }
 0x1c5   :  { %v1024_v4 = vmul.f32 0.001953125, %v1023_v58  ;;  %v2717_v58 = vld [vmem:[%s2941_s3 + $0x48] sm:$0xff] }
 0x1c6   :  { %v1027_v25 = vpop.xlane.xlu0 %1026 }
 0x1c7   :  { %v1029_v28 = vmul.f32 %v1024_v4, %v1024_v4  ;;  %v1028_v22 = vmul.f32 0.001953125, %v1027_v25  ;;  %v1043_v42 = vsub.f32 %v572_v63, %v1024_v4  ;;  %v1044_v43 = vsub.f32 %v573_v0, %v1024_v4 }
 0x1c8   :  { %v1062_v62 = vsub.f32 %v1010_v12, %v1024_v4  ;;  %v1063_v63 = vsub.f32 %v1011_v13, %v1024_v4 }
 0x1c9   :  { %v1030_v29 = vsub.f32 %v1028_v22, %v1029_v28 }
 0x1cb   :  { %v1031_v30 = vmax.f32 %v1030_v29, 0.0 }
 0x1cd   :  { %v1032_v31 = vadd.f32 1e-05, %v1031_v30 }
 0x1cf   :  { %2213 = vrsqrt.f32 %v1032_v31  ;;  %vm1039_vm10 = vweird.f32 %v1032_v31 }
 0x1d5   :  { %v2214_v32 = vpop.eup %2213 }
 0x1d6   :  { %v1034_v33 = vmul.f32 %v2214_v32, %v1032_v31  ;;  %vm1040_vm9 = vweird.f32 %v2214_v32  ;;  %v2732_v31 = vld [vmem:[%s2941_s3 + $0x58] sm:$0xff] }
 0x1d7   :  { %vm1041_vm11 = vmor %vm1039_vm10, %vm1040_vm9 }
 0x1d8   :  { %v1035_v35 = vmul.f32 %v2214_v32, %v1034_v33 }
 0x1da   :  { %v1036_v52 = vmul.f32 0.5, %v1035_v35 }
 0x1dc   :  { %v1037_v37 = vsub.f32 1.5, %v1036_v52 }
 0x1de   :  { %v1038_v41 = vmul.f32 %v2214_v32, %v1037_v37 }
 0x1e0   :  { %v1042_v44 = vsel %vm1041_vm11, %v2214_v32, %v1038_v41 }
 0x1e1   :  { %v1045_v45 = vmul.f32 %v1043_v42, %v1042_v44  ;;  %v1046_v46 = vmul.f32 %v1044_v43, %v1042_v44  ;;  %v1064_v0 = vmul.f32 %v1062_v62, %v1042_v44  ;;  %v1065_v6 = vmul.f32 %v1063_v63, %v1042_v44 }
 0x1e3   :  { %v1052_v7 = vmul.f32 %v1050_v36, %v1045_v45  ;;  %v1053_v47 = vmul.f32 %v1050_v36, %v1046_v46  ;;  %v1066_v8 = vmul.f32 %v1064_v0, %v1050_v36  ;;  %v1067_v50 = vmul.f32 %v1065_v6, %v1050_v36  ;;  %v2753_v45 = vld [vmem:[%s2941_s3 + $0x50] sm:$0xff] }
 0x1e4   :  { %v2777_v6 = vld [vmem:[%s2941_s3 + $0x70] sm:$0xff] }
 0x1e5   :  { %v1058_v49 = vadd.f32 %v1056_v59, %v1052_v7  ;;  %v1059_v60 = vadd.f32 %v1056_v59, %v1053_v47  ;;  %v1068_v56 = vadd.f32 %v1066_v8, %v1056_v59  ;;  %v1069_v38 = vadd.f32 %v1067_v50, %v1056_v59  ;;  %v2762_v47 = vld [vmem:[%s2941_s3 + $0x60] sm:$0xff] }
 0x1e7   :  { %v1060_v48 = vmax.f32 %v1058_v49, 0.0  ;;  %v1061_v61 = vmax.f32 %v1059_v60, 0.0  ;;  %v2656_v12 = vmax.f32 %v1068_v56, 0.0  ;;  %v2658_v13 = vmax.f32 %v1069_v38, 0.0 }
 0x1e9   :  { %1172 = vrot.lane.b32.xlu0 %v1061_v61, %s2249_s24  ;;  %1227 = vrot.lane.b32.xlu2 %v1061_v61, %s2247_s20 }
 0x1ea   :  { %1165 = vmatpush.msrb.mxu3 %v1061_v61  ;;  %1074 = vrot.lane.b32.xlu1 %v1060_v48, %s2248_s21 }
 0x1eb   :  { %1145 = vmatpush.msrb.mxu2 %v1060_v48  ;;  %2153 = vmatmul.msk.f32.vlgmr.msrb.gmra.mxu3 %vm46_vm0, %v2702_v5 }
 0x1ec   :  { %2152 = vmatmul.msk.f32.vlgmr.msrb.gmra.mxu2 %vm46_vm0, %v2702_v5 }
 0x1f1   :  { %1282 = vrot.lane.b32.xlu0 %v1061_v61, %s2251_s26  ;;  %1280 = vrot.lane.b32.xlu2 %v1060_v48, %s2251_s26 }
 0x1f2   :  { %1076 = vrot.lane.b32.xlu1 %v1061_v61, %s2248_s21 }
 0x1f9   :  { %1390 = vrot.lane.b32.xlu0 %v1060_v48, %s2253_s28  ;;  %1447 = vrot.lane.b32.xlu2 %v1061_v61, %s2252_s27 }
 0x1fa   :  { %1225 = vrot.lane.b32.xlu1 %v1060_v48, %s2247_s20 }
 0x201   :  { %1557 = vrot.lane.b32.xlu0 %v2658_v13, %s2248_s21  ;;  %1555 = vrot.lane.b32.xlu2 %v2656_v12, %s2248_s21 }
 0x202   :  { %1170 = vrot.lane.b32.xlu1 %v1060_v48, %s2249_s24 }
 0x209   :  { %1643 = vrot.lane.b32.xlu0 %v2656_v12, %s2249_s24  ;;  %1502 = vrot.lane.b32.xlu2 %v1061_v61, %s2254_s8 }
 0x20a   :  { %1335 = vrot.lane.b32.xlu1 %v1060_v48, %s2250_s25 }
 0x211   :  { %1745 = vrot.lane.b32.xlu0 %v2658_v13, %s2251_s26  ;;  %1743 = vrot.lane.b32.xlu2 %v2656_v12, %s2251_s26  ;;  %s2083_s26 = sshll.u32 %s2943_s5, 4  ;;  %s2084_s26 = int_to_ptr.hbm [resolvable:$true] %s2083_s26 }
 0x212   :  { %1337 = vrot.lane.b32.xlu1 %v1061_v61, %s2250_s25 }
 0x219   :  { %1843 = vrot.lane.b32.xlu0 %v2656_v12, %s2253_s28  ;;  %1695 = vrot.lane.b32.xlu2 %v2658_v13, %s2247_s20 }
 0x21a   :  { %1445 = vrot.lane.b32.xlu1 %v1060_v48, %s2252_s27 }
 0x221   :  { %1795 = vrot.lane.b32.xlu0 %v2658_v13, %s2250_s25  ;;  %1793 = vrot.lane.b32.xlu2 %v2656_v12, %s2250_s25 }
 0x222   :  { %1392 = vrot.lane.b32.xlu1 %v1061_v61, %s2253_s28 }
 0x229   :  { %1893 = vrot.lane.b32.xlu0 %v2656_v12, %s2252_s27  ;;  %1945 = vrot.lane.b32.xlu2 %v2658_v13, %s2254_s8 }
 0x22a   :  { %1500 = vrot.lane.b32.xlu1 %v1060_v48, %s2254_s8 }
 0x232   :  { %1645 = vrot.lane.b32.xlu1 %v2658_v13, %s2249_s24 }
 0x23a   :  { %1693 = vrot.lane.b32.xlu1 %v2656_v12, %s2247_s20 }
 0x242   :  { %1845 = vrot.lane.b32.xlu1 %v2658_v13, %s2253_s28 }
 0x243   :  { %v1228_v57 = vpop.permute.xlu2 %1227 }
 0x24a   :  { %1943 = vrot.lane.b32.xlu1 %v2656_v12, %s2254_s8  ;;  %s2260_s8 = smov 256  }
 0x24b   :  { %v1281_v32 = vpop.permute.xlu2 %1280 }
 0x252   :  { %1895 = vrot.lane.b32.xlu1 %v2658_v13, %s2252_s27 }
 0x253   :  { %v1448_v59 = vpop.permute.xlu2 %1447 }
 0x25b   :  { %v1173_v3 = vpop.permute.xlu0 %1172  ;;  %v1556_v60 = vpop.permute.xlu2 %1555 }
 0x25c   :  { %v1075_v2 = vpop.permute.xlu1 %1074 }
 0x263   :  { %v1283_v22 = vpop.permute.xlu0 %1282 }
 0x264   :  { %v1077_v14 = vpop.permute.xlu1 %1076  ;;  %v1284_v33 = vsel %vm263_vm6, %v1281_v32, %v1283_v22  ;;  %v1285_v35 = vsel %vm263_vm6, %v1283_v22, %v1281_v32 }
 0x265   :  { %v1078_v19 = vsel %vm34_vm3, %v1075_v2, %v1077_v14  ;;  %v1079_v34 = vsel %vm34_vm3, %v1077_v14, %v1075_v2  ;;  %v1286_v43 = vmul.f32 %v1285_v35, %v2468_v54  ;;  %v1287_v44 = vmul.f32 %v1284_v33, %v2470_v55  ;;  %v1503_v14 = vpop.permute.xlu2 %1502 }
 0x266   :  { %v1080_v20 = vmul.f32 %v1079_v34, %v2380_v15  ;;  %v1081_v21 = vmul.f32 %v1078_v19, %v2382_v16 }
 0x268   :  { %1102 = vmatpush.msrb.mxu0 %v1080_v20  ;;  %1122 = vmatpush.msrb.mxu1 %v1081_v21  ;;  %v2798_v21 = vld [vmem:[%s2941_s3 + $0x80] sm:$0xff] }
 0x269   :  { %2150 = vmatmul.msk.f32.vlgmr.msrb.gmra.mxu0 %vm46_vm0, %v2717_v58  ;;  %2151 = vmatmul.msk.f32.vlgmr.msrb.gmra.mxu1 %vm46_vm0, %v2717_v58 }
 0x26b   :  { %v1391_v46 = vpop.permute.xlu0 %1390 }
 0x26c   :  { %v1226_v4 = vpop.permute.xlu1 %1225 }
 0x26d   :  { %v1229_v25 = vsel %vm200_vm2, %v1226_v4, %v1228_v57  ;;  %v1230_v28 = vsel %vm200_vm2, %v1228_v57, %v1226_v4 }
 0x26e   :  { %v1231_v29 = vmul.f32 %v1230_v28, %v2384_v17  ;;  %v1232_v30 = vmul.f32 %v1229_v25, %v2386_v18 }
 0x270   :  { %1253 = vmatpush.msra.mxu2 %v1231_v29  ;;  %1273 = vmatpush.msra.mxu3 %v1232_v30  ;;  %v2813_v29 = vld [vmem:[%s2941_s3 + $0x78] sm:$0xff]  ;;  %v1744_v30 = vpop.permute.xlu2 %1743 }
 0x271   :  { %2158 = vmatmul.msk.f32.vlgmr.msra.gmra.mxu2 %vm46_vm0, %v2732_v31  ;;  %2159 = vmatmul.msk.f32.vlgmr.msra.gmra.mxu3 %vm46_vm0, %v2732_v31 }
 0x273   :  { %v1558_v49 = vpop.permute.xlu0 %1557 }
 0x274   :  { %v1171_v36 = vpop.permute.xlu1 %1170  ;;  %v1559_v8 = vsel %vm34_vm3, %v1556_v60, %v1558_v49  ;;  %v1560_v50 = vsel %vm34_vm3, %v1558_v49, %v1556_v60 }
 0x275   :  { %v1174_v52 = vsel %vm137_vm1, %v1171_v36, %v1173_v3  ;;  %v1175_v37 = vsel %vm137_vm1, %v1173_v3, %v1171_v36  ;;  %v1561_v57 = vmul.f32 %v1560_v50, %v2380_v15  ;;  %v1562_v20 = vmul.f32 %v1559_v8, %v2382_v16 }
 0x276   :  { %v1176_v41 = vmul.f32 %v1175_v37, %v2392_v23  ;;  %v1177_v42 = vmul.f32 %v1174_v52, %v2394_v24  ;;  %v2832_v37 = vld [vmem:[%s2941_s3 + $0x88] sm:$0xff] }
 0x278   :  { %1198 = vmatpush.msra.mxu0 %v1176_v41  ;;  %1218 = vmatpush.msra.mxu1 %v1177_v42 }
 0x279   :  { %2155 = vmatmul.msk.f32.vlgmr.msra.gmra.mxu0 %vm46_vm0, %v2753_v45  ;;  %2156 = vmatmul.msk.f32.vlgmr.msra.gmra.mxu1 %vm46_vm0, %v2753_v45 }
 0x27a   :  { %1308 = vmatpush.msrb.mxu0 %v1286_v43  ;;  %1328 = vmatpush.msrb.mxu1 %v1287_v44 }
 0x27b   :  { %v1644_v56 = vpop.permute.xlu0 %1643 }
 0x27c   :  { %v1336_v7 = vpop.permute.xlu1 %1335 }
 0x281   :  { %2161 = vmatmul.msk.f32.vlgmr.msrb.gmra.mxu0 %vm46_vm0, %v2762_v47  ;;  %2162 = vmatmul.msk.f32.vlgmr.msrb.gmra.mxu1 %vm46_vm0, %v2762_v47 }
 0x283   :  { %v1746_v25 = vpop.permute.xlu0 %1745 }
 0x284   :  { %v1338_v48 = vpop.permute.xlu1 %1337  ;;  %v1747_v43 = vsel %vm263_vm6, %v1744_v30, %v1746_v25  ;;  %v1748_v44 = vsel %vm263_vm6, %v1746_v25, %v1744_v30 }
 0x285   :  { %v1339_v61 = vsel %vm326_vm4, %v1336_v7, %v1338_v48  ;;  %v1340_v62 = vsel %vm326_vm4, %v1338_v48, %v1336_v7 }
 0x286   :  { %v1341_v63 = vmul.f32 %v1339_v61, %v2428_v39  ;;  %v1342_v0 = vmul.f32 %v1340_v62, %v2430_v40 }
 0x288   :  { %1363 = vmatpush.msrb.mxu2 %v1341_v63  ;;  %1383 = vmatpush.msrb.mxu3 %v1342_v0 }
 0x289   :  { %2164 = vmatmul.msk.f32.vlgmr.msrb.gmra.mxu2 %vm46_vm0, %v2777_v6  ;;  %2165 = vmatmul.msk.f32.vlgmr.msrb.gmra.mxu3 %vm46_vm0, %v2777_v6 }
 0x28b   :  { %v1844_v41 = vpop.permute.xlu0 %1843 }
 0x28c   :  { %v1446_v38 = vpop.permute.xlu1 %1445 }
 0x28d   :  { %v1449_v2 = vsel %vm452_vm5, %v1446_v38, %v1448_v59  ;;  %v1450_v3 = vsel %vm452_vm5, %v1448_v59, %v1446_v38 }
 0x28e   :  { %v1451_v19 = vmul.f32 %v1449_v2, %v2454_v51  ;;  %v1452_v34 = vmul.f32 %v1450_v3, %v2465_v53 }
 0x290   :  { %1473 = vmatpush.msra.mxu2 %v1451_v19  ;;  %1493 = vmatpush.msra.mxu3 %v1452_v34  ;;  %v1147_v19 = vpop.f32.mrf.mxu2  ;;  %v1167_v34 = vpop.f32.mrf.mxu3 }
 0x291   :  { %2170 = vmatmul.msk.f32.vlgmr.msra.gmra.mxu2 %vm46_vm0, %v2798_v21  ;;  %2171 = vmatmul.msk.f32.vlgmr.msra.gmra.mxu3 %vm46_vm0, %v2798_v21 }
 0x292   :  { %1578 = vmatpush.msrb.mxu2 %v1561_v57  ;;  %1598 = vmatpush.msrb.mxu3 %v1562_v20 }
 0x293   :  { %v1796_v60 = vpop.permute.xlu0 %1795 }
 0x294   :  { %v1393_v4 = vpop.permute.xlu1 %1392 }
 0x295   :  { %v1394_v15 = vsel %vm389_vm7, %v1391_v46, %v1393_v4  ;;  %v1395_v16 = vsel %vm389_vm7, %v1393_v4, %v1391_v46 }
 0x296   :  { %v1396_v28 = vmul.f32 %v1394_v15, %v2508_v9  ;;  %v1397_v22 = vmul.f32 %v1395_v16, %v2510_v10 }
 0x298   :  { %1418 = vmatpush.msra.mxu0 %v1396_v28  ;;  %1438 = vmatpush.msra.mxu1 %v1397_v22 }
 0x299   :  { %2167 = vmatmul.msk.f32.vlgmr.msra.gmra.mxu0 %vm46_vm0, %v2813_v29  ;;  %2168 = vmatmul.msk.f32.vlgmr.msra.gmra.mxu1 %vm46_vm0, %v2813_v29 }
 0x29a   :  { %2175 = vmatmul.msk.f32.vlgmr.msrb.gmra.mxu2 %vm46_vm0, %v2717_v58  ;;  %2176 = vmatmul.msk.f32.vlgmr.msrb.gmra.mxu3 %vm46_vm0, %v2717_v58  ;;  %v1696_v58 = vpop.permute.xlu2 %1695 }
 0x29c   :  { %v1501_v32 = vpop.permute.xlu1 %1500 }
 0x29d   :  { %v1504_v33 = vsel %vm515_vm8, %v1501_v32, %v1503_v14  ;;  %v1505_v35 = vsel %vm515_vm8, %v1503_v14, %v1501_v32 }
 0x29e   :  { %v1506_v36 = vmul.f32 %v1504_v33, %v2535_v26  ;;  %v1507_v52 = vmul.f32 %v1505_v35, %v2537_v27 }
 0x2a0   :  { %1528 = vmatpush.msrb.mxu0 %v1506_v36  ;;  %1548 = vmatpush.msrb.mxu1 %v1507_v52 }
 0x2a1   :  { %2173 = vmatmul.msk.f32.vlgmr.msrb.gmra.mxu0 %vm46_vm0, %v2832_v37  ;;  %2174 = vmatmul.msk.f32.vlgmr.msrb.gmra.mxu1 %vm46_vm0, %v2832_v37 }
 0x2a2   :  { %1618 = vmatpush.msra.mxu0 %v2656_v12  ;;  %1638 = vmatpush.msra.mxu1 %v2658_v13  ;;  %v1749_v12 = vmul.f32 %v1748_v44, %v2468_v54  ;;  %v1750_v13 = vmul.f32 %v1747_v43, %v2470_v55  ;;  %v2257_v44 = vmov 2  }
 0x2a3   :  { %2210 = vset.pattern.permute.xlu1 %v2257_v44 }
 0x2a4   :  { %v1646_v42 = vpop.permute.xlu1 %1645  ;;  %2028 = vperm.xlu1 %2210, %v2643_v1  }
 0x2a5   :  { %v1647_v46 = vsel %vm137_vm1, %v1644_v56, %v1646_v42  ;;  %v1648_v59 = vsel %vm137_vm1, %v1646_v42, %v1644_v56 }
 0x2a6   :  { %v1649_v7 = vmul.f32 %v1648_v59, %v2392_v23  ;;  %v1650_v49 = vmul.f32 %v1647_v46, %v2394_v24  ;;  %v1794_v23 = vpop.permute.xlu2 %1793  ;;  %v2258_v46 = vmov 3  }
 0x2a7   :  { %v1797_v54 = vsel %vm326_vm4, %v1794_v23, %v1796_v60  ;;  %v1798_v55 = vsel %vm326_vm4, %v1796_v60, %v1794_v23  ;;  %2212 = vset.pattern.permute.xlu0 %v2258_v46 }
 0x2a8   :  { %1666 = vmatpush.msra.mxu2 %v1649_v7  ;;  %1686 = vmatpush.msra.mxu3 %v1650_v49  ;;  %v1800_v63 = vmul.f32 %v1798_v55, %v2430_v40 }
 0x2a9   :  { %2179 = vmatmul.msk.f32.vlgmr.msra.gmra.mxu2 %vm46_vm0, %v2753_v45  ;;  %2180 = vmatmul.msk.f32.vlgmr.msra.gmra.mxu3 %vm46_vm0, %v2753_v45 }
 0x2aa   :  { %1766 = vmatpush.msrb.mxu2 %v1749_v12  ;;  %1786 = vmatpush.msrb.mxu3 %v1750_v13 }
 0x2ab   :  { %2177 = vmatmul.msk.f32.vlgmr.msra.gmra.mxu0 %vm46_vm0, %v2702_v5  ;;  %2178 = vmatmul.msk.f32.vlgmr.msra.gmra.mxu1 %vm46_vm0, %v2702_v5  ;;  %v1799_v5 = vmul.f32 %v1797_v54, %v2428_v39 }
 0x2ac   :  { %v1694_v24 = vpop.permute.xlu1 %1693  ;;  %2211 = vset.pattern.permute.xlu1 %v2258_v46 }
 0x2ad   :  { %v1697_v45 = vsel %vm200_vm2, %v1694_v24, %v1696_v58  ;;  %v1698_v48 = vsel %vm200_vm2, %v1696_v58, %v1694_v24  ;;  %2034 = vperm.xlu1 %2211, %v2643_v1  }
 0x2ae   :  { %v1699_v61 = vmul.f32 %v1698_v48, %v2384_v17  ;;  %v1700_v62 = vmul.f32 %v1697_v45, %v2386_v18 }
 0x2b0   :  { %1716 = vmatpush.msrb.mxu0 %v1699_v61  ;;  %1736 = vmatpush.msrb.mxu1 %v1700_v62 }
 0x2b1   :  { %2183 = vmatmul.msk.f32.vlgmr.msrb.gmra.mxu2 %vm46_vm0, %v2762_v47  ;;  %2184 = vmatmul.msk.f32.vlgmr.msrb.gmra.mxu3 %vm46_vm0, %v2762_v47 }
 0x2b2   :  { %1816 = vmatpush.msra.mxu0 %v1799_v5  ;;  %1836 = vmatpush.msra.mxu1 %v1800_v63 }
 0x2b3   :  { %2181 = vmatmul.msk.f32.vlgmr.msrb.gmra.mxu0 %vm46_vm0, %v2732_v31  ;;  %2182 = vmatmul.msk.f32.vlgmr.msrb.gmra.mxu1 %vm46_vm0, %v2732_v31  ;;  %v1946_v31 = vpop.permute.xlu2 %1945 }
 0x2b4   :  { %v1846_v17 = vpop.permute.xlu1 %1845 }
 0x2b5   :  { %v1847_v18 = vsel %vm389_vm7, %v1844_v41, %v1846_v17  ;;  %v1848_v39 = vsel %vm389_vm7, %v1846_v17, %v1844_v41 }
 0x2b6   :  { %v1849_v40 = vmul.f32 %v1847_v18, %v2508_v9  ;;  %v1850_v0 = vmul.f32 %v1848_v39, %v2510_v10 }
 0x2b8   :  { %1866 = vmatpush.msra.mxu2 %v1849_v40  ;;  %1886 = vmatpush.msra.mxu3 %v1850_v0 }
 0x2b9   :  { %2187 = vmatmul.msk.f32.vlgmr.msra.gmra.mxu2 %vm46_vm0, %v2813_v29  ;;  %2188 = vmatmul.msk.f32.vlgmr.msra.gmra.mxu3 %vm46_vm0, %v2813_v29 }
 0x2bb   :  { %2185 = vmatmul.msk.f32.vlgmr.msra.gmra.mxu0 %vm46_vm0, %v2777_v6  ;;  %2186 = vmatmul.msk.f32.vlgmr.msra.gmra.mxu1 %vm46_vm0, %v2777_v6  ;;  %v1894_v6 = vpop.permute.xlu0 %1893 }
 0x2bc   :  { %v1944_v47 = vpop.permute.xlu1 %1943 }
 0x2bd   :  { %v1947_v9 = vsel %vm515_vm8, %v1944_v47, %v1946_v31  ;;  %v1948_v10 = vsel %vm515_vm8, %v1946_v31, %v1944_v47 }
 0x2be   :  { %v1949_v8 = vmul.f32 %v1947_v9, %v2535_v26  ;;  %v1950_v50 = vmul.f32 %v1948_v10, %v2537_v27 }
 0x2c0   :  { %1966 = vmatpush.msrb.mxu2 %v1949_v8  ;;  %1986 = vmatpush.msrb.mxu3 %v1950_v50 }
 0x2c1   :  { %2191 = vmatmul.msk.f32.vlgmr.msrb.gmra.mxu2 %vm46_vm0, %v2832_v37  ;;  %2192 = vmatmul.msk.f32.vlgmr.msrb.gmra.mxu3 %vm46_vm0, %v2832_v37 }
 0x2c4   :  { %v1896_v56 = vpop.permute.xlu1 %1895 }
 0x2c5   :  { %v1897_v38 = vsel %vm452_vm5, %v1894_v6, %v1896_v56  ;;  %v1898_v2 = vsel %vm452_vm5, %v1896_v56, %v1894_v6 }
 0x2c6   :  { %v1899_v26 = vmul.f32 %v1897_v38, %v2454_v51  ;;  %v1900_v27 = vmul.f32 %v1898_v2, %v2465_v53 }
 0x2c8   :  { %1916 = vmatpush.msrb.mxu0 %v1899_v26  ;;  %1936 = vmatpush.msrb.mxu1 %v1900_v27 }
 0x2c9   :  { %2189 = vmatmul.msk.f32.vlgmr.msrb.gmra.mxu0 %vm46_vm0, %v2798_v21  ;;  %2190 = vmatmul.msk.f32.vlgmr.msrb.gmra.mxu1 %vm46_vm0, %v2798_v21 }
 0x2e6   :  { %v1104_v3 = vpop.f32.mrf.mxu0  ;;  %v1124_v14 = vpop.f32.mrf.mxu1 }
 0x2e7   :  { %v1148_v41 = vadd.f32 %v1147_v19, %v1104_v3  ;;  %v1168_v58 = vadd.f32 %v1167_v34, %v1124_v14 }
 0x2f4   :  { %v1255_v11 = vpop.f32.mrf.mxu2  ;;  %v1275_v4 = vpop.f32.mrf.mxu3 }
 0x2f6   :  { %v1200_v57 = vpop.f32.mrf.mxu0  ;;  %v1220_v20 = vpop.f32.mrf.mxu1 }
 0x2f7   :  { %v1223_v42 = vadd.f32 %v1200_v57, %v1148_v41  ;;  %v1224_v43 = vadd.f32 %v1220_v20, %v1168_v58 }
 0x2f9   :  { %v1278_v13 = vadd.f32 %v1255_v11, %v1223_v42  ;;  %v1279_v60 = vadd.f32 %v1275_v4, %v1224_v43 }
 0x2fe   :  { %v1310_v15 = vpop.f32.mrf.mxu0  ;;  %v1330_v51 = vpop.f32.mrf.mxu1 }
 0x2ff   :  { %v1333_v45 = vadd.f32 %v1310_v15, %v1278_v13  ;;  %v1334_v48 = vadd.f32 %v1330_v51, %v1279_v60 }
 0x30c   :  { %v1365_v16 = vpop.f32.mrf.mxu2  ;;  %v1385_v53 = vpop.f32.mrf.mxu3 }
 0x30d   :  { %v1388_v17 = vadd.f32 %v1365_v16, %v1333_v45  ;;  %v1389_v18 = vadd.f32 %v1385_v53, %v1334_v48 }
 0x314   :  { %v1475_v22 = vpop.f32.mrf.mxu2  ;;  %v1495_v29 = vpop.f32.mrf.mxu3 }
 0x316   :  { %v1420_v25 = vpop.f32.mrf.mxu0  ;;  %v1440_v28 = vpop.f32.mrf.mxu1 }
 0x317   :  { %v1443_v47 = vadd.f32 %v1420_v25, %v1388_v17  ;;  %v1444_v9 = vadd.f32 %v1440_v28, %v1389_v18  ;;  %v2029_v43 = vpop.permute.xlu1 %2028 }
 0x319   :  { %v1498_v50 = vadd.f32 %v1475_v22, %v1443_v47  ;;  %v1499_v6 = vadd.f32 %v1495_v29, %v1444_v9 }
 0x31d   :  { %v1580_v33 = vpop.f32.mrf.mxu2  ;;  %v1600_v21 = vpop.f32.mrf.mxu3 }
 0x31e   :  { %v1530_v30 = vpop.f32.mrf.mxu0  ;;  %v1550_v32 = vpop.f32.mrf.mxu1 }
 0x31f   :  { %v1553_v26 = vadd.f32 %v1530_v30, %v1498_v50  ;;  %v1554_v27 = vadd.f32 %v1550_v32, %v1499_v6 }
 0x321   :  { %v1993_v11 = vmul.f32 %v1553_v26, %v1553_v26  ;;  %v1994_v4 = vmul.f32 %v1554_v27, %v1554_v27 }
 0x328   :  { %v1620_v35 = vpop.f32.mrf.mxu0  ;;  %v1640_v36 = vpop.f32.mrf.mxu1 }
 0x329   :  { %v1621_v23 = vadd.f32 %v1620_v35, %v1580_v33  ;;  %v1641_v24 = vadd.f32 %v1640_v36, %v1600_v21 }
 0x32c   :  { %v1668_v52 = vpop.f32.mrf.mxu2  ;;  %v1688_v37 = vpop.f32.mrf.mxu3 }
 0x32d   :  { %v1691_v54 = vadd.f32 %v1668_v52, %v1621_v23  ;;  %v1692_v55 = vadd.f32 %v1688_v37, %v1641_v24  ;;  %v2051_v23 = vld [vmem:[%s2939_s1] sm:$0x3]  ;;  %v2193_v24 = vld [vmem:[%s2939_s1 + $0x2] sm:$0x3]  ;;  %s2259_s1 = smov [#allocation2]  }
 0x32e   :  { %v2053_v18 = vperm.slane %v2051_v23, 0  ;;  %s2081_s30 = sshll.u32 %s2259_s1, 4  ;;  %s2082_s30 = int_to_ptr.vmem [resolvable:$true] %s2081_s30 }
 0x330   :  { %v1718_v59 = vpop.f32.mrf.mxu0  ;;  %v1738_v7 = vpop.f32.mrf.mxu1 }
 0x331   :  { %v1741_v61 = vadd.f32 %v1718_v59, %v1691_v54  ;;  %v1742_v62 = vadd.f32 %v1738_v7, %v1692_v55 }
 0x334   :  { %v1768_v49 = vpop.f32.mrf.mxu2  ;;  %v1788_v12 = vpop.f32.mrf.mxu3 }
 0x335   :  { %v1791_v0 = vadd.f32 %v1768_v49, %v1741_v61  ;;  %v1792_v31 = vadd.f32 %v1788_v12, %v1742_v62  ;;  %v2035_v61 = vpop.permute.xlu1 %2034 }
 0x338   :  { %v1818_v39 = vpop.f32.mrf.mxu0  ;;  %v1838_v40 = vpop.f32.mrf.mxu1 }
 0x339   :  { %v1841_v10 = vadd.f32 %v1818_v39, %v1791_v0  ;;  %v1842_v8 = vadd.f32 %v1838_v40, %v1792_v31  ;;  %v2054_v39 = vperm.slane %v2051_v23, 1  ;;  %v2066_v40 = vperm.slane %v2193_v24, 0 }
 0x33a   :  { %v2067_v0 = vperm.slane %v2193_v24, 1 }
 0x33c   :  { %v1868_v5 = vpop.f32.mrf.mxu2  ;;  %v1888_v63 = vpop.f32.mrf.mxu3 }
 0x33d   :  { %v1891_v56 = vadd.f32 %v1868_v5, %v1841_v10  ;;  %v1892_v38 = vadd.f32 %v1888_v63, %v1842_v8 }
 0x344   :  { %v1968_v2 = vpop.f32.mrf.mxu2  ;;  %v1988_v1 = vpop.f32.mrf.mxu3 }
 0x346   :  { %v1918_v3 = vpop.f32.mrf.mxu0  ;;  %v1938_v14 = vpop.f32.mrf.mxu1 }
 0x347   :  { %v1941_v19 = vadd.f32 %v1918_v3, %v1891_v56  ;;  %v1942_v34 = vadd.f32 %v1938_v14, %v1892_v38  ;;  %v2218_v14 = vld [vmem:[%s2938_s0 + $0x8] sm:$0xff] }
 0x349   :  { %v1991_v57 = vadd.f32 %v1968_v2, %v1941_v19  ;;  %v1992_v20 = vadd.f32 %v1988_v1, %v1942_v34  ;;  %v2219_v34 = vld [vmem:[%s2938_s0 + $0x10] sm:$0xff] }
 0x34b   :  { %v1997_v15 = vmul.f32 %v1991_v57, %v1991_v57  ;;  %v1998_v51 = vmul.f32 %v1992_v20, %v1992_v20  ;;  %v1995_v16 = vadd.f32 %v1991_v57, %v1553_v26  ;;  %v1996_v53 = vadd.f32 %v1992_v20, %v1554_v27 }
 0x34d   :  { %v2001_v25 = vadd.f32 %v1996_v53, %v1995_v16  ;;  %v1999_v28 = vadd.f32 %v1997_v15, %v1993_v11  ;;  %v2000_v22 = vadd.f32 %v1998_v51, %v1994_v4 }
 0x34f   :  { %2002 = vadd.xlane.f32.xlu2 %v2001_v25  ;;  %v2005_v29 = vadd.f32 %v2000_v22, %v1999_v28 }
 0x351   :  { %2006 = vadd.xlane.f32.xlu0 %v2005_v29 }
 0x3c2   :  { %v2003_v30 = vpop.xlane.xlu2 %2002 }
 0x3c3   :  { %v2004_v32 = vmul.f32 0.001953125, %v2003_v30 }
 0x3c4   :  { %v2007_v33 = vpop.xlane.xlu0 %2006 }
 0x3c5   :  { %v2009_v21 = vmul.f32 %v2004_v32, %v2004_v32  ;;  %v2008_v35 = vmul.f32 0.001953125, %v2007_v33  ;;  %v2023_v7 = vsub.f32 %v1553_v26, %v2004_v32  ;;  %v2024_v49 = vsub.f32 %v1554_v27, %v2004_v32  ;;  %v2217_v27 = vld [vmem:[%s2938_s0] sm:$0xff] }
 0x3c6   :  { %v2041_v12 = vsub.f32 %v1991_v57, %v2004_v32  ;;  %v2042_v13 = vsub.f32 %v1992_v20, %v2004_v32  ;;  %v2220_v20 = vld [vmem:[%s2938_s0 + $0x18] sm:$0xff] }
 0x3c7   :  { %v2010_v36 = vsub.f32 %v2008_v35, %v2009_v21 }
 0x3c9   :  { %v2011_v52 = vmax.f32 %v2010_v36, 0.0 }
 0x3cb   :  { %v2012_v37 = vadd.f32 1e-05, %v2011_v52 }
 0x3cd   :  { %2215 = vrsqrt.f32 %v2012_v37  ;;  %vm2019_vm13 = vweird.f32 %v2012_v37 }
 0x3d3   :  { %v2216_v41 = vpop.eup %2215 }
 0x3d4   :  { %v2014_v58 = vmul.f32 %v2216_v41, %v2012_v37  ;;  %vm2020_vm12 = vweird.f32 %v2216_v41 }
 0x3d5   :  { %vm2021_vm14 = vmor %vm2019_vm13, %vm2020_vm12 }
 0x3d6   :  { %v2015_v42 = vmul.f32 %v2216_v41, %v2014_v58 }
 0x3d8   :  { %v2016_v44 = vmul.f32 0.5, %v2015_v42 }
 0x3da   :  { %v2017_v46 = vsub.f32 1.5, %v2016_v44 }
 0x3dc   :  { %v2018_v59 = vmul.f32 %v2216_v41, %v2017_v46 }
 0x3de   :  { %v2022_v60 = vsel %vm2021_vm14, %v2216_v41, %v2018_v59 }
 0x3df   :  { %v2025_v54 = vmul.f32 %v2023_v7, %v2022_v60  ;;  %v2026_v55 = vmul.f32 %v2024_v49, %v2022_v60  ;;  %v2043_v45 = vmul.f32 %v2041_v12, %v2022_v60  ;;  %v2044_v48 = vmul.f32 %v2042_v13, %v2022_v60 }
 0x3e1   :  { %v2031_v62 = vmul.f32 %v2029_v43, %v2025_v54  ;;  %v2032_v5 = vmul.f32 %v2029_v43, %v2026_v55  ;;  %v2045_v63 = vmul.f32 %v2043_v45, %v2029_v43  ;;  %v2046_v17 = vmul.f32 %v2044_v48, %v2029_v43 }
 0x3e3   :  { %v2037_v31 = vadd.f32 %v2035_v61, %v2031_v62  ;;  %v2038_v47 = vadd.f32 %v2035_v61, %v2032_v5  ;;  %v2047_v9 = vadd.f32 %v2045_v63, %v2035_v61  ;;  %v2048_v10 = vadd.f32 %v2046_v17, %v2035_v61 }
 0x3e5   :  { %v2039_v8 = vmax.f32 %v2037_v31, 0.0  ;;  %v2040_v50 = vmax.f32 %v2038_v47, 0.0  ;;  %v2049_v6 = vmax.f32 %v2047_v9, 0.0  ;;  %v2050_v56 = vmax.f32 %v2048_v10, 0.0 }
 0x3e7   :  { %v2057_v38 = vmul.f32 %v2053_v18, %v2039_v8  ;;  %v2058_v2 = vmul.f32 %v2054_v39, %v2040_v50  ;;  %v2070_v1 = vmul.f32 %v2066_v40, %v2049_v6  ;;  %v2071_v26 = vmul.f32 %v2067_v0, %v2050_v56 }
 0x3e9   :  { %v2059_v3 = vadd.f32 %v2217_v27, %v2057_v38  ;;  %v2060_v19 = vadd.f32 %v2218_v14, %v2058_v2  ;;  %v2072_v57 = vadd.f32 %v2219_v34, %v2070_v1  ;;  %v2073_v11 = vadd.f32 %v2220_v20, %v2071_v26 }
 0x3eb   :  { %2061 = vst [vmem:[#allocation2] sm:$0xff] %v2059_v3 }
 0x3ec   :  { %2062 = vst [vmem:[#allocation2 + $0x8] sm:$0xff] %v2060_v19 }
 0x3ed   :  { %2075 = vst [vmem:[#allocation2 + $0x10] sm:$0xff] %v2072_v57 }
 0x3ee   :  { %2076 = vst [vmem:[#allocation2 + $0x18] sm:$0xff] %v2073_v11 }
 0x3ef   :  { %2089 = dma.vmem_to_hbm [thread:$0]  %s2082_s30, 512, %s2084_s26, [#allocation3], %s2260_s8, %s2260_s8, %s2249_s24  }
 0x3f0   :  { %2245 = dma.done.wait [#allocation3], 512  }
 0x3f1   :  { %2246 = vsyncadd [#allocation3], 4294966784 }
 0x3f2   :  { %2094 = vsyncpa [#allocation3], 1 }

</bundles_post_ra>
